<compile_context>
chip_gen: v7x
topology: tpu7x:2x2x1
jax: 0.10.0
libtpu: 0.0.40
codegen_flags: <defaults>
</compile_context>

<pallas_src>
import functools
import numpy as np
import jax
import jax.numpy as jnp
from jax.experimental import pallas as pl
from jax.experimental.pallas import tpu as pltpu


# --------------------------------------------------------------------------- #
# Kernel
# --------------------------------------------------------------------------- #
def _dc_kernel(x_ref, ur_ref, ui_ref, keep_ref, fwd_ref, inv_ref, o_ref, kd_ref):
    """One grid step over TB image slices, spatial dims flattened on the lane axis.

    x_ref    : (TB, HWp)       real image slices (already batch/channel-shifted)
    ur/ui    : (TB, HWp)       under-sampled k-space (real / imag), f32
    keep_ref : (1|TB, HWp)     1 - mask, f32
    fwd_ref  : (HWp, 2*HWp)    [Re | Im] of the fftshift(fft2(.)) operator
    inv_ref  : (2*HWp, 2*HWp)  stacked [[Re, Im], [-Im, Re]] of ifft2(ifftshift(.))
    o_ref    : (TB, HWp)       |ifft2(ifftshift(k_dc))|
    kd_ref   : (TB, 2*HWp)     VMEM scratch holding [kd_re | kd_im]
    """
    hw = fwd_ref.shape[0]  # lane-padded H*W (static)

    # k = fftshift(fft2(x)) over the spatial dims: ONE fused real matmul
    # (x is real) producing [k_re | k_im] lane-stacked, f32 accumulation.
    k = jnp.dot(x_ref[...], fwd_ref[...], preferred_element_type=jnp.float32)

    # Data consistency: (1 - mask) * k + x_under (kept in f32, cast only for MXU).
    keep = keep_ref[...]
    kd_ref[:, :hw] = (keep * k[:, :hw] + ur_ref[...]).astype(kd_ref.dtype)
    kd_ref[:, hw:] = (keep * k[:, hw:] + ui_ref[...]).astype(kd_ref.dtype)

    # |ifft2(ifftshift(k_dc))|: ONE fused real matmul against the stacked operator.
    z = jnp.dot(kd_ref[...], inv_ref[...], preferred_element_type=jnp.float32)
    z_re = z[:, :hw]
    z_im = z[:, hw:]
    o_ref[...] = jnp.sqrt(z_re * z_re + z_im * z_im).astype(o_ref.dtype)


# --------------------------------------------------------------------------- #
# Operator construction (host-side, cached)
# --------------------------------------------------------------------------- #
@functools.lru_cache(maxsize=8)
def _dft_operators(H, W, HWp):
    """Spatially-shifted 2D (i)DFT as dense matrices acting on row-flattened images,
    zero-padded to the lane-aligned width HWp."""
    HW = H * W
    basis = np.eye(HW, dtype=np.complex64).reshape(HW, H, W)
    # forward: fftshift(fft2(.)) over the spatial dims (row k = transform of e_k)
    df = np.fft.fftshift(np.fft.fft2(basis), axes=(-2, -1)).reshape(HW, HW)
    # inverse: ifft2(ifftshift(.)) over the spatial dims
    di = np.fft.ifft2(np.fft.ifftshift(basis, axes=(-2, -1))).reshape(HW, HW)

    dfp = np.zeros((HWp, HWp), np.complex64)
    dfp[:HW, :HW] = df
    dip = np.zeros((HWp, HWp), np.complex64)
    dip[:HW, :HW] = di

    fwd = np.concatenate([dfp.real, dfp.imag], axis=1).astype(np.float32)     # (HWp, 2*HWp)
    inv = np.concatenate(                                                     # (2*HWp, 2*HWp)
        [np.concatenate([dip.real, dip.imag], axis=1),
         np.concatenate([-dip.imag, dip.real], axis=1)], axis=0).astype(np.float32)
    return fwd, inv


@functools.lru_cache(maxsize=8)
def _batch_shift_src(N, C):
    """Source-row indices equivalent to fftshift over the (batch, channel) axes."""
    nn = np.arange(N).reshape(N, 1)
    cc = np.arange(C).reshape(1, C)
    return (((nn - N // 2) % N) * C + ((cc - C // 2) % C)).reshape(N * C).astype(np.int32)


# --------------------------------------------------------------------------- #
# Tiling / VMEM planning
# --------------------------------------------------------------------------- #
def _pick_tb(B):
    """Rows per grid step: whole batch when tiny; otherwise the largest 8-aligned
    divisor <= 256, preferring >= 2 blocks so v7x's second TensorCore gets work."""
    if B < 16:
        return B                       # full-dim block (always layout-legal)
    hi = min(256, B // 2)              # >= 2 blocks -> megacore sharding on v7x
    for t in range(hi, 7, -1):
        if B % t == 0 and t % 8 == 0:
            return t
    return B


def _device_vmem_bytes():
    """Per-core VMEM capacity; conservative 64 MiB (v7x) if the query is unavailable."""
    try:
        info = pltpu.get_tpu_info()
        cap = getattr(info, "vmem_capacity_bytes", None)
        if cap:
            return int(cap)
    except Exception:
        pass
    return 64 << 20


def _vmem_required_bytes(TB, HWp, op_bytes, shared_mask):
    """Worst-case VMEM footprint assuming the default double-buffered pipeline.
    (Grid-invariant operators are DMA'd only once, but still get 2 buffers.)"""
    f32 = 4
    buf = 2
    operators = (HWp * 2 * HWp + 2 * HWp * 2 * HWp) * op_bytes * buf   # fwd + stacked inv
    slabs = TB * HWp * (op_bytes + 3 * f32) * buf                      # x + ur + ui + out
    keep = (HWp if shared_mask else TB * HWp) * f32 * buf
    kd_scratch = TB * 2 * HWp * op_bytes
    intermediates = 4 * TB * 2 * HWp * f32                             # k, z + slack
    return operators + slabs + keep + kd_scratch + intermediates


def _make_call(B, TB, HWp, shared_mask, op_dtype, vmem_limit):
    def slab_spec():
        return pl.BlockSpec((TB, HWp), lambda g: (g, 0))

    def const_spec(shape):
        # Grid-invariant operand: same block every step -> fetched once.
        return pl.BlockSpec(shape, lambda g: (0,) * len(shape))

    keep_spec = const_spec((1, HWp)) if shared_mask else slab_spec()

    op_b = jnp.dtype(op_dtype).itemsize
    flops = 12 * B * HWp * HWp                                         # fwd + fused inverse
    bytes_acc = (B * HWp * (op_b + 3 * 4)                              # x, ur, ui, out
                 + (2 * HWp * HWp + 4 * HWp * HWp) * op_b              # operators (once)
                 + (HWp if shared_mask else B * HWp) * 4)              # keep

    return pl.pallas_call(
        _dc_kernel,
        out_shape=jax.ShapeDtypeStruct((B, HWp), jnp.float32),
        grid_spec=pltpu.PrefetchScalarGridSpec(
            num_scalar_prefetch=0,
            grid=(B // TB,),
            in_specs=[
                slab_spec(),                       # x_rec slices (already NC-shifted)
                slab_spec(),                       # x_under real
                slab_spec(),                       # x_under imag
                keep_spec,                         # 1 - mask
                const_spec((HWp, 2 * HWp)),        # forward shifted-DFT operator
                const_spec((2 * HWp, 2 * HWp)),    # stacked inverse operator
            ],
            out_specs=slab_spec(),
            scratch_shapes=[pltpu.VMEM((TB, 2 * HWp), op_dtype)],      # kd = [re | im]
        ),
        compiler_params=pltpu.CompilerParams(
            dimension_semantics=("parallel",),     # batch blocks shard across v7x TCs
            vmem_limit_bytes=int(vmem_limit)),
        cost_estimate=pl.CostEstimate(
            flops=int(flops),
            transcendentals=int(B * HWp),          # the sqrt in the magnitude
            bytes_accessed=int(bytes_acc)),
    )


# --------------------------------------------------------------------------- #
# Public wrapper
# --------------------------------------------------------------------------- #
def dc_layer_i(x_rec, x_under_re, x_under_im, mask, operand_dtype=jnp.float32):
    """Pallas TPU forward of DC_layer_I.

    x_rec          : (N, C, H, W) float32 reconstructed image
    x_under_re/_im : (N, C, H, W) float32 under-sampled k-space (complex split)
    mask           : broadcastable to (N, C, H, W) sampling mask
    operand_dtype  : jnp.float32 (default, meets the 1e-2 bar) or jnp.bfloat16
                     (full-rate MXU on v5e/v6e/v7x; f32 accumulation; validate
                     tolerance at your image size before making it the default).
    """
    N, C, H, W = x_rec.shape
    B, HW = N * C, H * W
    HWp = ((HW + 127) // 128) * 128           # lane-dense (128-aligned) spatial axis
    pad = HWp - HW

    op_dtype = jnp.dtype(operand_dtype)
    op_bytes = op_dtype.itemsize

    # Shared-mask detection from the mask shape only (no broadcast materialized).
    mask = jnp.asarray(mask, jnp.float32)
    lead = int(np.prod(mask.shape[:-2])) if mask.ndim > 2 else 1
    shared_mask = (lead == 1)

    TB = _pick_tb(B)

    # Deterministic VMEM plan: worst-case (double-buffered) footprint vs device VMEM.
    required = _vmem_required_bytes(TB, HWp, op_bytes, shared_mask)
    budget = _device_vmem_bytes() - (4 << 20)
    if required > budget:
        # TODO(synk): separable row/column DFT schedule ((W,2W)+(H,2H) operators)
        # for large H*W; the dense (HWp, 2*HWp) operators only fit VMEM for small images.
        raise NotImplementedError(
            f"dc_layer_i dense-operator path needs ~{required >> 20} MiB VMEM "
            f"(> {budget >> 20} MiB available); use a smaller image or bfloat16.")
    vmem_limit = min(budget, max(32 << 20, 2 * required + (8 << 20)))

    # torch's all-dim fftshift also shifts the (N, C) axes: a pure row permutation
    # of the flattened batch, applied as one gather fused into the reshape (no MXU
    # permutation matmul, no extra jnp.roll pass).
    src = jnp.asarray(_batch_shift_src(N, C))
    xb = jnp.take(x_rec.reshape(B, HW), src, axis=0).astype(op_dtype)

    urb = x_under_re.reshape(B, HW).astype(jnp.float32)
    uib = x_under_im.reshape(B, HW).astype(jnp.float32)

    if shared_mask:
        keep = (1.0 - mask).reshape(1, HW)    # fetched once, never broadcast to (N,C,H,W)
    else:
        keep = (1.0 - jnp.broadcast_to(mask, (N, C, H, W))).reshape(B, HW)

    if pad:
        xb = jnp.pad(xb, ((0, 0), (0, pad)))
        urb = jnp.pad(urb, ((0, 0), (0, pad)))
        uib = jnp.pad(uib, ((0, 0), (0, pad)))
        keep = jnp.pad(keep, ((0, 0), (0, pad)))

    fwd_np, inv_np = _dft_operators(H, W, HWp)
    fwd = jnp.asarray(fwd_np, dtype=op_dtype)
    inv = jnp.asarray(inv_np, dtype=op_dtype)

    out = _make_call(B, TB, HWp, shared_mask, op_dtype, vmem_limit)(
        xb, urb, uib, keep, fwd, inv)

    if pad:
        out = out[:, :HW]
    return out.reshape(N, C, H, W)


# --------------------------------------------------------------------------- #
# Reference & demo
# --------------------------------------------------------------------------- #
def _reference(x_rec, x_under_c, mask):
    k_temp = jnp.fft.fftshift(jnp.fft.fft2(x_rec))                # default: shift ALL dims
    k_dc = (1.0 - mask) * k_temp + x_under_c
    return jnp.abs(jnp.fft.ifft2(jnp.fft.ifftshift(k_dc, axes=(-2, -1))))


if __name__ == "__main__":
    N, C, H, W = 2, 4, 16, 16
    key = jax.random.PRNGKey(0)
    k1, k2, k3, k4 = jax.random.split(key, 4)

    x_rec = jax.random.normal(k1, (N, C, H, W), dtype=jnp.float32)
    x_under_re = jax.random.normal(k2, (N, C, H, W), dtype=jnp.float32)
    x_under_im = jax.random.normal(k3, (N, C, H, W), dtype=jnp.float32)
    mask = (jax.random.uniform(k4, (1, 1, H, W)) < 0.4).astype(jnp.float32)

    ref = jnp.asarray(
        _reference(x_rec.astype(jnp.complex64),
                   (x_under_re + 1j * x_under_im).astype(jnp.complex64), mask),
        jnp.float32)

    # Precision-safe default path (f32 operands, f32 accumulation).
    out = jax.block_until_ready(dc_layer_i(x_rec, x_under_re, x_under_im, mask))
    max_err = float(jnp.max(jnp.abs(out - ref)))
    assert max_err < 1e-2, f"f32 path mismatch vs FFT reference: {max_err}"

    # Full-rate-MXU fast path (bf16 operators / x / kd, f32 accumulation).
    out_bf16 = jax.block_until_ready(
        dc_layer_i(x_rec, x_under_re, x_under_im, mask, operand_dtype=jnp.bfloat16))
    max_err_bf16 = float(jnp.max(jnp.abs(out_bf16 - ref)))
    assert max_err_bf16 < 1e-1, f"bf16 path mismatch vs FFT reference: {max_err_bf16}"

    print("KERNEL_OK")
</pallas_src>

<mosaic_0001>
module attributes {stable_mosaic.version = 11 : i64} {
  func.func @_dc_kernel(%arg0: i32, %arg1: memref<8x256xf32, #tpu.memory_space<vmem>>, %arg2: memref<8x256xf32, #tpu.memory_space<vmem>>, %arg3: memref<8x256xf32, #tpu.memory_space<vmem>>, %arg4: memref<1x256xf32, #tpu.memory_space<vmem>>, %arg5: memref<256x512xf32, #tpu.memory_space<vmem>>, %arg6: memref<512x512xf32, #tpu.memory_space<vmem>>, %arg7: memref<8x256xf32, #tpu.memory_space<vmem>>, %arg8: memref<8x512xf32, #tpu.memory_space<vmem>>) attributes {dimension_semantics = [#tpu.dimension_semantics<parallel>], iteration_bounds = array<i64: 1>, scalar_prefetch = 0 : i64, scratch_operands = 1 : i64, tpu.core_type = #tpu.core_type<tc>, window_params = [{transform_indices = @transform_0, window_bounds = array<i64: 8, 256>}, {transform_indices = @transform_1, window_bounds = array<i64: 8, 256>}, {transform_indices = @transform_2, window_bounds = array<i64: 8, 256>}, {pipeline_mode = #tpu.pipeline_mode<synchronous>, transform_indices = @transform_3, window_bounds = array<i64: 1, 256>}, {pipeline_mode = #tpu.pipeline_mode<synchronous>, transform_indices = @transform_4, window_bounds = array<i64: 256, 512>}, {pipeline_mode = #tpu.pipeline_mode<synchronous>, transform_indices = @transform_5, window_bounds = array<i64: 512, 512>}, {transform_indices = @transform_6, window_bounds = array<i64: 8, 256>}]} {
    %c0 = arith.constant 0 : index
    %c0_0 = arith.constant 0 : index
    %0 = vector.load %arg1[%c0, %c0_0] : memref<8x256xf32, #tpu.memory_space<vmem>>, vector<8x256xf32>
    %c0_1 = arith.constant 0 : index
    %c0_2 = arith.constant 0 : index
    %1 = vector.load %arg5[%c0_1, %c0_2] : memref<256x512xf32, #tpu.memory_space<vmem>>, vector<256x512xf32>
    %cst = arith.constant dense<0.000000e+00> : vector<8x512xf32>
    %2 = tpu.matmul %0, %1, %cst {dimension_numbers = #tpu.dot_dimension_numbers<[1], [0], [0], [1], [0, 0, 1, 1], [], []>} : vector<8x256xf32>, vector<256x512xf32>, vector<8x512xf32> -> vector<8x512xf32>
    %c0_3 = arith.constant 0 : index
    %c0_4 = arith.constant 0 : index
    %3 = vector.load %arg4[%c0_3, %c0_4] : memref<1x256xf32, #tpu.memory_space<vmem>>, vector<1x256xf32>
    %4 = vector.extract_strided_slice %2 {offsets = [0, 0], sizes = [8, 256], strides = [1, 1]} : vector<8x512xf32> to vector<8x256xf32>
    %5 = vector.broadcast %3 : vector<1x256xf32> to vector<8x256xf32>
    %6 = arith.mulf %5, %4 : vector<8x256xf32>
    %c0_5 = arith.constant 0 : index
    %c0_6 = arith.constant 0 : index
    %7 = vector.load %arg2[%c0_5, %c0_6] : memref<8x256xf32, #tpu.memory_space<vmem>>, vector<8x256xf32>
    %8 = arith.addf %6, %7 : vector<8x256xf32>
    %c0_7 = arith.constant 0 : index
    %c0_8 = arith.constant 0 : index
    %9 = vector.load %arg8[%c0_7, %c0_8] : memref<8x512xf32, #tpu.memory_space<vmem>>, vector<8x256xf32>
    tpu.vector_store %arg8[%c0_7, %c0_8], %8 {strides = array<i32>} : memref<8x512xf32, #tpu.memory_space<vmem>>, vector<8x256xf32>,
    %10 = vector.extract_strided_slice %2 {offsets = [0, 256], sizes = [8, 256], strides = [1, 1]} : vector<8x512xf32> to vector<8x256xf32>
    %11 = vector.broadcast %3 : vector<1x256xf32> to vector<8x256xf32>
    %12 = arith.mulf %11, %10 : vector<8x256xf32>
    %c0_9 = arith.constant 0 : index
    %c0_10 = arith.constant 0 : index
    %13 = vector.load %arg3[%c0_9, %c0_10] : memref<8x256xf32, #tpu.memory_space<vmem>>, vector<8x256xf32>
    %14 = arith.addf %12, %13 : vector<8x256xf32>
    %c0_11 = arith.constant 0 : index
    %c256 = arith.constant 256 : index
    %15 = vector.load %arg8[%c0_11, %c256] : memref<8x512xf32, #tpu.memory_space<vmem>>, vector<8x256xf32>
    tpu.vector_store %arg8[%c0_11, %c256], %14 {strides = array<i32>} : memref<8x512xf32, #tpu.memory_space<vmem>>, vector<8x256xf32>,
    %c0_12 = arith.constant 0 : index
    %c0_13 = arith.constant 0 : index
    %16 = vector.load %arg8[%c0_12, %c0_13] : memref<8x512xf32, #tpu.memory_space<vmem>>, vector<8x512xf32>
    %c0_14 = arith.constant 0 : index
    %c0_15 = arith.constant 0 : index
    %17 = vector.load %arg6[%c0_14, %c0_15] : memref<512x512xf32, #tpu.memory_space<vmem>>, vector<512x512xf32>
    %cst_16 = arith.constant dense<0.000000e+00> : vector<8x512xf32>
    %18 = tpu.matmul %16, %17, %cst_16 {dimension_numbers = #tpu.dot_dimension_numbers<[1], [0], [0], [1], [0, 0, 1, 1], [], []>} : vector<8x512xf32>, vector<512x512xf32>, vector<8x512xf32> -> vector<8x512xf32>
    %19 = vector.extract_strided_slice %18 {offsets = [0, 0], sizes = [8, 256], strides = [1, 1]} : vector<8x512xf32> to vector<8x256xf32>
    %20 = vector.extract_strided_slice %18 {offsets = [0, 256], sizes = [8, 256], strides = [1, 1]} : vector<8x512xf32> to vector<8x256xf32>
    %21 = arith.mulf %19, %19 : vector<8x256xf32>
    %22 = arith.mulf %20, %20 : vector<8x256xf32>
    %23 = arith.addf %21, %22 : vector<8x256xf32>
    %24 = math.sqrt %23 : vector<8x256xf32>
    %c0_17 = arith.constant 0 : index
    %c0_18 = arith.constant 0 : index
    %25 = vector.load %arg7[%c0_17, %c0_18] : memref<8x256xf32, #tpu.memory_space<vmem>>, vector<8x256xf32>
    tpu.vector_store %arg7[%c0_17, %c0_18], %24 {strides = array<i32>} : memref<8x256xf32, #tpu.memory_space<vmem>>, vector<8x256xf32>,
    return
  }
  func.func @transform_0(%arg0: i32) -> (i32, i32) {
    %c0_i32 = arith.constant 0 : i32
    %c0_i32_0 = arith.constant 0 : i32
    return %arg0, %c0_i32 : i32, i32
  }
  func.func @transform_1(%arg0: i32) -> (i32, i32) {
    %c0_i32 = arith.constant 0 : i32
    %c0_i32_0 = arith.constant 0 : i32
    return %arg0, %c0_i32 : i32, i32
  }
  func.func @transform_2(%arg0: i32) -> (i32, i32) {
    %c0_i32 = arith.constant 0 : i32
    %c0_i32_0 = arith.constant 0 : i32
    return %arg0, %c0_i32 : i32, i32
  }
  func.func @transform_3(%arg0: i32) -> (i32, i32) {
    %c0_i32 = arith.constant 0 : i32
    %c0_i32_0 = arith.constant 0 : i32
    %c0_i32_1 = arith.constant 0 : i32
    return %c0_i32, %c0_i32_0 : i32, i32
  }
  func.func @transform_4(%arg0: i32) -> (i32, i32) {
    %c0_i32 = arith.constant 0 : i32
    %c0_i32_0 = arith.constant 0 : i32
    %c0_i32_1 = arith.constant 0 : i32
    return %c0_i32, %c0_i32_0 : i32, i32
  }
  func.func @transform_5(%arg0: i32) -> (i32, i32) {
    %c0_i32 = arith.constant 0 : i32
    %c0_i32_0 = arith.constant 0 : i32
    %c0_i32_1 = arith.constant 0 : i32
    return %c0_i32, %c0_i32_0 : i32, i32
  }
  func.func @transform_6(%arg0: i32) -> (i32, i32) {
    %c0_i32 = arith.constant 0 : i32
    %c0_i32_0 = arith.constant 0 : i32
    return %arg0, %c0_i32 : i32, i32
  }
}

</mosaic_0001>

<bundles_post_ra>
// kernel: tpu_custom_call.1
= control target key start
LH: loop header
LB: loop body
LE: loop exit
PB: predicated region body
PF: predicated region fallthrough
CT: control target
= control target key end

     0   :  { %11 = vsyncpa [#allocation4], 0  ;;  %s1655_s0 = inlined_call_operand.hbm [shape: f32[8,256], index: 0, kind: input, shape index: {}]   ;;  %s1656_s1 = inlined_call_operand.hbm [shape: f32[8,256], index: 1, kind: input, shape index: {}]   ;;  %s1657_s2 = inlined_call_operand.hbm [shape: f32[8,256], index: 2, kind: input, shape index: {}]   ;;  %s1658_s3 = inlined_call_operand.vmem [shape: f32[1,256], index: 3, kind: input, shape index: {}]   ;;  %s1659_s4 = inlined_call_operand.hbm [shape: f32[256,512], index: 4, kind: input, shape index: {}]   ;;  %s1660_s5 = inlined_call_operand.hbm [shape: f32[512,512], index: 5, kind: input, shape index: {}]   ;;  %s1661_s6 = inlined_call_operand.hbm [shape: f32[8,256], index: 6, kind: output, shape index: {}]  }
   0x1   :  { %12 = vsyncpa [#allocation7], 0 }
   0x2   :  { %13 = vsyncpa [#allocation10], 0 }
   0x3   :  { %14 = vsyncpa [#allocation5], 0  ;;  %s1509_s21 = smov [#allocation6]   ;;  %s1510_s23 = smov [#allocation9]  }
   0x4   :  { %s31_s22 = sshll.u32 %s1509_s21, 4  ;;  %s52_s24 = sshll.u32 %s1510_s23, 4  ;;  %s32_s22 = int_to_ptr.vmem [resolvable:$true] %s31_s22  ;;  %s1552_s24 = int_to_ptr.vmem [resolvable:$true] %s52_s24 }
   0x5   :  { %s1369_s27 = scalar_lea.hbm %s1656_s1, 256 }
   0x6   :  { %p1370_p0 = scmp.ne.s32.totalorder %s1656_s1, %s1369_s27  ;;  %p1373_p1 = scmp.lt.u32.totalorder %s1369_s27, %s1656_s1 }
   0x8   :  { %p1375_p2 = pnand %p1373_p1, %p1370_p0 }
   0xa   :  { %1378 = shalt.err (!%p1375_p2)
}
   0xb   :  { %s1379_s8 = scalar_lea.vmem %s32_s22, 256  ;;  %p1384_p4 = scmp.lt.s32.totalorder %s32_s22, %s32_s22 }
   0xc   :  { %p1380_p3 = scmp.ne.s32.totalorder %s32_s22, %s1379_s8  ;;  %p1385_p5 = scmp.lt.s32.totalorder %s1379_s8, %s1379_s8 }
   0xe   :  { %p1386_p6 = por %p1385_p5, %p1384_p4 }
  0x10   :  { %p1387_p7 = pnand %p1386_p6, %p1380_p3 }
  0x12   :  { %1390 = shalt.err (!%p1387_p7)
}
  0x13   :  { %34 = dma.hbm_to_vmem [thread:$0]  %s1656_s1, 256, %s32_s22, [#allocation7]  }
  0x14   :  { %s1391_s13 = scalar_lea.hbm %s1659_s4, 16384 }
  0x15   :  { %p1392_p8 = scmp.ne.s32.totalorder %s1659_s4, %s1391_s13  ;;  %p1395_p9 = scmp.lt.u32.totalorder %s1391_s13, %s1659_s4 }
  0x17   :  { %p1397_p10 = pnand %p1395_p9, %p1392_p8 }
  0x19   :  { %1400 = shalt.err (!%p1397_p10)
}
  0x1a   :  { %s1401_s18 = scalar_lea.vmem %s1552_s24, 16384  ;;  %p1406_p12 = scmp.lt.s32.totalorder %s1552_s24, %s1552_s24 }
  0x1b   :  { %p1402_p11 = scmp.ne.s32.totalorder %s1552_s24, %s1401_s18  ;;  %p1407_p13 = scmp.lt.s32.totalorder %s1401_s18, %s1401_s18 }
  0x1d   :  { %p1408_p0 = por %p1407_p13, %p1406_p12 }
  0x1f   :  { %p1409_p1 = pnand %p1408_p0, %p1402_p11 }
  0x21   :  { %1412 = shalt.err (!%p1409_p1)
}
  0x22   :  { %s1511_s1 = smov 512   ;;  %s1512_s19 = smov 32  }
  0x23   :  { %58 = dma.hbm_to_vmem [thread:$0]  %s1659_s4, 16384, %s1552_s24, [#allocation10], %s1511_s1, %s1511_s1, %s1512_s19  }
  0x24   :  { %s1513_s22 = smov [#allocation3]   ;;  %s1514_s25 = smov [#allocation8]  }
  0x25   :  { %s21_s23 = sshll.u32 %s1513_s22, 4  ;;  %s41_s26 = sshll.u32 %s1514_s25, 4  ;;  %s22_s23 = int_to_ptr.vmem [resolvable:$true] %s21_s23  ;;  %s42_s26 = int_to_ptr.vmem [resolvable:$true] %s41_s26 }
  0x26   :  { %s1413_s29 = scalar_lea.hbm %s1655_s0, 256 }
  0x27   :  { %p1414_p2 = scmp.ne.s32.totalorder %s1655_s0, %s1413_s29  ;;  %p1417_p3 = scmp.lt.u32.totalorder %s1413_s29, %s1655_s0 }
  0x29   :  { %p1419_p4 = pnand %p1417_p3, %p1414_p2 }
  0x2b   :  { %1422 = shalt.err (!%p1419_p4)
}
  0x2c   :  { %s1423_s4 = scalar_lea.vmem %s22_s23, 256  ;;  %p1428_p6 = scmp.lt.s32.totalorder %s22_s23, %s22_s23 }
  0x2d   :  { %p1424_p5 = scmp.ne.s32.totalorder %s22_s23, %s1423_s4  ;;  %p1429_p7 = scmp.lt.s32.totalorder %s1423_s4, %s1423_s4 }
  0x2f   :  { %p1430_p8 = por %p1429_p7, %p1428_p6 }
  0x31   :  { %p1431_p9 = pnand %p1430_p8, %p1424_p5 }
  0x33   :  { %1434 = shalt.err (!%p1431_p9)
}
  0x34   :  { %24 = dma.hbm_to_vmem [thread:$0]  %s1655_s0, 256, %s22_s23, [#allocation4]  }
  0x35   :  { %s1435_s13 = scalar_lea.hbm %s1657_s2, 256 }
  0x36   :  { %p1436_p10 = scmp.ne.s32.totalorder %s1657_s2, %s1435_s13  ;;  %p1439_p11 = scmp.lt.u32.totalorder %s1435_s13, %s1657_s2 }
  0x38   :  { %p1441_p12 = pnand %p1439_p11, %p1436_p10 }
  0x3a   :  { %1444 = shalt.err (!%p1441_p12)
}
  0x3b   :  { %s1445_s18 = scalar_lea.vmem %s42_s26, 256  ;;  %p1450_p0 = scmp.lt.s32.totalorder %s42_s26, %s42_s26 }
  0x3c   :  { %p1446_p13 = scmp.ne.s32.totalorder %s42_s26, %s1445_s18  ;;  %p1451_p1 = scmp.lt.s32.totalorder %s1445_s18, %s1445_s18 }
  0x3e   :  { %p1452_p2 = por %p1451_p1, %p1450_p0 }
  0x40   :  { %p1453_p3 = pnand %p1452_p2, %p1446_p13 }
  0x42   :  { %1456 = shalt.err (!%p1453_p3)
}
  0x43   :  { %44 = dma.hbm_to_vmem [thread:$0]  %s1657_s2, 256, %s42_s26, [#allocation7]  }
  0x44   :  { %s1515_s21 = smov [#allocation11]   ;;  %s1457_s27 = scalar_lea.hbm %s1660_s5, 32768 }
  0x45   :  { %s64_s22 = sshll.u32 %s1515_s21, 4  ;;  %p1458_p4 = scmp.ne.s32.totalorder %s1660_s5, %s1457_s27  ;;  %s65_s22 = int_to_ptr.vmem [resolvable:$true] %s64_s22 }
  0x46   :  { %p1461_p5 = scmp.lt.u32.totalorder %s1457_s27, %s1660_s5 }
  0x48   :  { %p1463_p6 = pnand %p1461_p5, %p1458_p4 }
  0x4a   :  { %1466 = shalt.err (!%p1463_p6)
}
  0x4b   :  { %s1467_s8 = scalar_lea.vmem %s65_s22, 32768  ;;  %p1472_p8 = scmp.lt.s32.totalorder %s65_s22, %s65_s22 }
  0x4c   :  { %p1468_p7 = scmp.ne.s32.totalorder %s65_s22, %s1467_s8  ;;  %p1473_p9 = scmp.lt.s32.totalorder %s1467_s8, %s1467_s8 }
  0x4e   :  { %p1474_p10 = por %p1473_p9, %p1472_p8 }
  0x50   :  { %p1475_p11 = pnand %p1474_p10, %p1468_p7 }
  0x52   :  { %1478 = shalt.err (!%p1475_p11)
}
  0x53   :  { %70 = dma.hbm_to_vmem [thread:$0]  %s1660_s5, 32768, %s65_s22, [#allocation10], %s1511_s1, %s1511_s1, %s1512_s19  }
  0x54   :  { %1501 = dma.done.wait [#allocation4], 256  }
  0x55   :  { %1502 = vsyncadd [#allocation4], 4294967040 }
  0x56   :  { %1503 = dma.done.wait [#allocation7], 512  }
  0x57   :  { %1504 = vsyncadd [#allocation7], 4294966784 }
  0x58   :  { %1505 = dma.done.wait [#allocation10], 49152  }
  0x59   :  { %1506 = vsyncadd [#allocation10], 4294918144  ;;  %v89_v0 = vld [vmem:[#allocation9 + $0x8] sm:$0xff]  ;;  %v88_v2 = vld [vmem:[#allocation9] sm:$0xff] }
  0x5a   :  { %v93_v1 = vld [vmem:[#allocation9 + $0x28] sm:$0xff]  ;;  %v92_v4 = vld [vmem:[#allocation9 + $0x20] sm:$0xff]  ;;  %v91_v43 = vld [vmem:[#allocation9 + $0x18] sm:$0xff] }
  0x5b   :  { %v969_v3 = vpack.c.bf16 %v93_v1, %v89_v0  ;;  %v97_v5 = vld [vmem:[#allocation9 + $0x48] sm:$0xff]  ;;  %v971_v7 = vpack.c.bf16 %v92_v4, %v88_v2  ;;  %v96_v9 = vld [vmem:[#allocation9 + $0x40] sm:$0xff]  ;;  %v95_v44 = vld [vmem:[#allocation9 + $0x38] sm:$0xff] }
  0x5c   :  { %v101_v6 = vld [vmem:[#allocation9 + $0x68] sm:$0xff]  ;;  %v100_v10 = vld [vmem:[#allocation9 + $0x60] sm:$0xff]  ;;  %v1033_v45 = vpack.c.bf16 %v95_v44, %v91_v43  ;;  %v87_v46 = vld [vmem:[#allocation3 + $0x8] sm:$0xff] }
  0x5d   :  { %v973_v8 = vpack.c.bf16 %v101_v6, %v97_v5  ;;  %v105_v11 = vld [vmem:[#allocation9 + $0x88] sm:$0xff]  ;;  %970 = vmatprep.subr.bf16.mxu0 %v969_v3  ;;  %v975_v13 = vpack.c.bf16 %v100_v10, %v96_v9  ;;  %v104_v15 = vld [vmem:[#allocation9 + $0x80] sm:$0xff]  ;;  %v90_v47 = vld [vmem:[#allocation9 + $0x10] sm:$0xff]  ;;  %280 = vmatprep.mubr.f32.mxu0 %v87_v46 }
  0x5e   :  { %v109_v12 = vld [vmem:[#allocation9 + $0xa8] sm:$0xff]  ;;  %972 = vmatpush1.bf16.msra.mxu0 %v971_v7  ;;  %v108_v16 = vld [vmem:[#allocation9 + $0xa0] sm:$0xff]  ;;  %v94_v48 = vld [vmem:[#allocation9 + $0x30] sm:$0xff]  ;;  %351 = vmatprep.mubr.f32.mxu1 %v87_v46 }
  0x5f   :  { %974 = vmatprep.subr.bf16.mxu0 %v973_v8  ;;  %v977_v14 = vpack.c.bf16 %v109_v12, %v105_v11  ;;  %v113_v17 = vld [vmem:[#allocation9 + $0xc8] sm:$0xff]  ;;  %v979_v19 = vpack.c.bf16 %v108_v16, %v104_v15  ;;  %v112_v21 = vld [vmem:[#allocation9 + $0xc0] sm:$0xff]  ;;  %v1035_v50 = vpack.c.bf16 %v94_v48, %v90_v47  ;;  %v99_v51 = vld [vmem:[#allocation9 + $0x58] sm:$0xff]  ;;  %1034 = vmatprep.subr.bf16.mxu1 %v1033_v45 }
  0x60   :  { %v117_v18 = vld [vmem:[#allocation9 + $0xe8] sm:$0xff]  ;;  %v116_v22 = vld [vmem:[#allocation9 + $0xe0] sm:$0xff]  ;;  %v103_v52 = vld [vmem:[#allocation9 + $0x78] sm:$0xff] }
  0x61   :  { %v981_v20 = vpack.c.bf16 %v117_v18, %v113_v17  ;;  %v121_v23 = vld [vmem:[#allocation9 + $0x108] sm:$0xff]  ;;  %v983_v25 = vpack.c.bf16 %v116_v22, %v112_v21  ;;  %v120_v27 = vld [vmem:[#allocation9 + $0x100] sm:$0xff]  ;;  %v1037_v54 = vpack.c.bf16 %v103_v52, %v99_v51  ;;  %v98_v55 = vld [vmem:[#allocation9 + $0x50] sm:$0xff]  ;;  %1036 = vmatpush1.bf16.msra.mxu1 %v1035_v50 }
  0x62   :  { %976 = vmatpush1.bf16.msra.mxu0 %v975_v13  ;;  %v125_v24 = vld [vmem:[#allocation9 + $0x128] sm:$0xff]  ;;  %v124_v28 = vld [vmem:[#allocation9 + $0x120] sm:$0xff]  ;;  %v102_v56 = vld [vmem:[#allocation9 + $0x70] sm:$0xff] }
  0x63   :  { %978 = vmatprep.subr.bf16.mxu0 %v977_v14  ;;  %v985_v26 = vpack.c.bf16 %v125_v24, %v121_v23  ;;  %v129_v29 = vld [vmem:[#allocation9 + $0x148] sm:$0xff]  ;;  %v987_v31 = vpack.c.bf16 %v124_v28, %v120_v27  ;;  %v128_v33 = vld [vmem:[#allocation9 + $0x140] sm:$0xff]  ;;  %v107_v57 = vld [vmem:[#allocation9 + $0x98] sm:$0xff]  ;;  %v1039_v61 = vpack.c.bf16 %v102_v56, %v98_v55  ;;  %1038 = vmatprep.subr.bf16.mxu1 %v1037_v54 }
  0x64   :  { %v133_v30 = vld [vmem:[#allocation9 + $0x168] sm:$0xff]  ;;  %v132_v34 = vld [vmem:[#allocation9 + $0x160] sm:$0xff]  ;;  %v111_v62 = vld [vmem:[#allocation9 + $0xb8] sm:$0xff] }
  0x65   :  { %v989_v32 = vpack.c.bf16 %v133_v30, %v129_v29  ;;  %v137_v35 = vld [vmem:[#allocation9 + $0x188] sm:$0xff]  ;;  %v991_v37 = vpack.c.bf16 %v132_v34, %v128_v33  ;;  %v136_v38 = vld [vmem:[#allocation9 + $0x180] sm:$0xff]  ;;  %v1041_v0 = vpack.c.bf16 %v111_v62, %v107_v57  ;;  %v106_v1 = vld [vmem:[#allocation9 + $0x90] sm:$0xff]  ;;  %1040 = vmatpush1.bf16.msra.mxu1 %v1039_v61 }
  0x66   :  { %980 = vmatpush1.bf16.msra.mxu0 %v979_v19  ;;  %v141_v36 = vld [vmem:[#allocation9 + $0x1a8] sm:$0xff]  ;;  %v140_v39 = vld [vmem:[#allocation9 + $0x1a0] sm:$0xff]  ;;  %v110_v2 = vld [vmem:[#allocation9 + $0xb0] sm:$0xff] }
  0x67   :  { %982 = vmatprep.subr.bf16.mxu0 %v981_v20  ;;  %v145_v40 = vld [vmem:[#allocation9 + $0x1c8] sm:$0xff]  ;;  %v993_v41 = vpack.c.bf16 %v141_v36, %v137_v35  ;;  %v144_v49 = vld [vmem:[#allocation9 + $0x1c0] sm:$0xff]  ;;  %v995_v53 = vpack.c.bf16 %v140_v39, %v136_v38  ;;  %v115_v3 = vld [vmem:[#allocation9 + $0xd8] sm:$0xff]  ;;  %v1043_v10 = vpack.c.bf16 %v110_v2, %v106_v1  ;;  %1042 = vmatprep.subr.bf16.mxu1 %v1041_v0 }
  0x68   :  { %v149_v42 = vld [vmem:[#allocation9 + $0x1e8] sm:$0xff]  ;;  %v148_v59 = vld [vmem:[#allocation9 + $0x1e0] sm:$0xff]  ;;  %v119_v4 = vld [vmem:[#allocation9 + $0xf8] sm:$0xff] }
  0x69   :  { %v997_v58 = vpack.c.bf16 %v149_v42, %v145_v40  ;;  %v153_v60 = vld [vmem:[#allocation9 + $0x208] sm:$0xff]  ;;  %v999_v5 = vpack.c.bf16 %v148_v59, %v144_v49  ;;  %v152_v7 = vld [vmem:[#allocation9 + $0x200] sm:$0xff]  ;;  %v1045_v12 = vpack.c.bf16 %v119_v4, %v115_v3  ;;  %v114_v13 = vld [vmem:[#allocation9 + $0xd0] sm:$0xff]  ;;  %1044 = vmatpush1.bf16.msra.mxu1 %v1043_v10 }
  0x6a   :  { %984 = vmatpush1.bf16.msra.mxu0 %v983_v25  ;;  %v157_v63 = vld [vmem:[#allocation9 + $0x228] sm:$0xff]  ;;  %v156_v8 = vld [vmem:[#allocation9 + $0x220] sm:$0xff]  ;;  %v118_v14 = vld [vmem:[#allocation9 + $0xf0] sm:$0xff] }
  0x6b   :  { %986 = vmatprep.subr.bf16.mxu0 %v985_v26  ;;  %v1001_v6 = vpack.c.bf16 %v157_v63, %v153_v60  ;;  %v161_v9 = vld [vmem:[#allocation9 + $0x248] sm:$0xff]  ;;  %v123_v15 = vld [vmem:[#allocation9 + $0x118] sm:$0xff]  ;;  %v1003_v17 = vpack.c.bf16 %v156_v8, %v152_v7  ;;  %v160_v19 = vld [vmem:[#allocation9 + $0x240] sm:$0xff]  ;;  %v1047_v22 = vpack.c.bf16 %v118_v14, %v114_v13  ;;  %1046 = vmatprep.subr.bf16.mxu1 %v1045_v12 }
  0x6c   :  { %v165_v11 = vld [vmem:[#allocation9 + $0x268] sm:$0xff]  ;;  %v127_v16 = vld [vmem:[#allocation9 + $0x138] sm:$0xff]  ;;  %v164_v20 = vld [vmem:[#allocation9 + $0x260] sm:$0xff] }
  0x6d   :  { %v1005_v18 = vpack.c.bf16 %v165_v11, %v161_v9  ;;  %v169_v21 = vld [vmem:[#allocation9 + $0x288] sm:$0xff]  ;;  %v1049_v24 = vpack.c.bf16 %v127_v16, %v123_v15  ;;  %v122_v25 = vld [vmem:[#allocation9 + $0x110] sm:$0xff]  ;;  %v131_v27 = vld [vmem:[#allocation9 + $0x158] sm:$0xff]  ;;  %v1007_v29 = vpack.c.bf16 %v164_v20, %v160_v19  ;;  %1048 = vmatpush1.bf16.msra.mxu1 %v1047_v22 }
  0x6e   :  { %988 = vmatpush1.bf16.msra.mxu0 %v987_v31  ;;  %v173_v23 = vld [vmem:[#allocation9 + $0x2a8] sm:$0xff]  ;;  %v126_v26 = vld [vmem:[#allocation9 + $0x130] sm:$0xff]  ;;  %v135_v28 = vld [vmem:[#allocation9 + $0x178] sm:$0xff] }
  0x6f   :  { %990 = vmatprep.subr.bf16.mxu0 %v989_v32  ;;  %v1009_v30 = vpack.c.bf16 %v173_v23, %v169_v21  ;;  %v168_v31 = vld [vmem:[#allocation9 + $0x280] sm:$0xff]  ;;  %v177_v33 = vld [vmem:[#allocation9 + $0x2c8] sm:$0xff]  ;;  %v1051_v34 = vpack.c.bf16 %v126_v26, %v122_v25  ;;  %1050 = vmatprep.subr.bf16.mxu1 %v1049_v24  ;;  %v1053_v36 = vpack.c.bf16 %v135_v28, %v131_v27  ;;  %v134_v38 = vld [vmem:[#allocation9 + $0x170] sm:$0xff] }
  0x70   :  { %v172_v32 = vld [vmem:[#allocation9 + $0x2a0] sm:$0xff]  ;;  %v181_v35 = vld [vmem:[#allocation9 + $0x2e8] sm:$0xff]  ;;  %v139_v39 = vld [vmem:[#allocation9 + $0x198] sm:$0xff] }
  0x71   :  { %v143_v40 = vld [vmem:[#allocation9 + $0x1b8] sm:$0xff]  ;;  %v1013_v42 = vpack.c.bf16 %v181_v35, %v177_v33  ;;  %v176_v43 = vld [vmem:[#allocation9 + $0x2c0] sm:$0xff]  ;;  %v185_v45 = vld [vmem:[#allocation9 + $0x308] sm:$0xff]  ;;  %1052 = vmatpush1.bf16.msra.mxu1 %v1051_v34 }
  0x72   :  { %992 = vmatpush1.bf16.msra.mxu0 %v991_v37  ;;  %v130_v37 = vld [vmem:[#allocation9 + $0x150] sm:$0xff]  ;;  %v180_v44 = vld [vmem:[#allocation9 + $0x2e0] sm:$0xff]  ;;  %v189_v47 = vld [vmem:[#allocation9 + $0x328] sm:$0xff]  ;;  %1054 = vmatprep.subr.bf16.mxu1 %v1053_v36  ;;  %v1057_v48 = vpack.c.bf16 %v143_v40, %v139_v39 }
  0x73   :  { %994 = vmatprep.subr.bf16.mxu0 %v993_v41  ;;  %v1011_v41 = vpack.c.bf16 %v172_v32, %v168_v31  ;;  %v1055_v46 = vpack.c.bf16 %v134_v38, %v130_v37  ;;  %v138_v49 = vld [vmem:[#allocation9 + $0x190] sm:$0xff]  ;;  %v147_v51 = vld [vmem:[#allocation9 + $0x1d8] sm:$0xff]  ;;  %v1017_v54 = vpack.c.bf16 %v189_v47, %v185_v45  ;;  %v184_v55 = vld [vmem:[#allocation9 + $0x300] sm:$0xff] }
  0x74   :  { %v142_v50 = vld [vmem:[#allocation9 + $0x1b0] sm:$0xff]  ;;  %v151_v52 = vld [vmem:[#allocation9 + $0x1f8] sm:$0xff]  ;;  %v188_v56 = vld [vmem:[#allocation9 + $0x320] sm:$0xff] }
  0x75   :  { %v193_v57 = vld [vmem:[#allocation9 + $0x348] sm:$0xff]  ;;  %1056 = vmatpush1.bf16.msra.mxu1 %v1055_v46  ;;  %v1061_v60 = vpack.c.bf16 %v151_v52, %v147_v51  ;;  %v146_v61 = vld [vmem:[#allocation9 + $0x1d0] sm:$0xff]  ;;  %v155_v63 = vld [vmem:[#allocation9 + $0x218] sm:$0xff]  ;;  %v1019_v1 = vpack.c.bf16 %v188_v56, %v184_v55 }
  0x76   :  { %996 = vmatpush1.bf16.msra.mxu0 %v995_v53  ;;  %v1015_v53 = vpack.c.bf16 %v180_v44, %v176_v43  ;;  %v197_v59 = vld [vmem:[#allocation9 + $0x368] sm:$0xff]  ;;  %1058 = vmatprep.subr.bf16.mxu1 %v1057_v48  ;;  %v150_v62 = vld [vmem:[#allocation9 + $0x1f0] sm:$0xff]  ;;  %v159_v0 = vld [vmem:[#allocation9 + $0x238] sm:$0xff] }
  0x77   :  { %998 = vmatprep.subr.bf16.mxu0 %v997_v58  ;;  %v1059_v58 = vpack.c.bf16 %v142_v50, %v138_v49  ;;  %v1021_v2 = vpack.c.bf16 %v197_v59, %v193_v57  ;;  %v192_v3 = vld [vmem:[#allocation9 + $0x340] sm:$0xff]  ;;  %v205_v7 = vld [vmem:[#allocation9 + $0x3a8] sm:$0xff]  ;;  %v1065_v8 = vpack.c.bf16 %v159_v0, %v155_v63  ;;  %v154_v9 = vld [vmem:[#allocation9 + $0x210] sm:$0xff] }
  0x78   :  { %v196_v4 = vld [vmem:[#allocation9 + $0x360] sm:$0xff]  ;;  %v158_v10 = vld [vmem:[#allocation9 + $0x230] sm:$0xff]  ;;  %v163_v11 = vld [vmem:[#allocation9 + $0x258] sm:$0xff] }
  0x79   :  { %1060 = vmatpush1.bf16.msra.mxu1 %v1059_v58  ;;  %v167_v12 = vld [vmem:[#allocation9 + $0x278] sm:$0xff]  ;;  %v1023_v13 = vpack.c.bf16 %v196_v4, %v192_v3  ;;  %v200_v15 = vld [vmem:[#allocation9 + $0x380] sm:$0xff]  ;;  %v213_v19 = vld [vmem:[#allocation9 + $0x3e8] sm:$0xff] }
  0x7a   :  { %1000 = vmatpush1.bf16.msra.mxu0 %v999_v5  ;;  %v201_v5 = vld [vmem:[#allocation9 + $0x388] sm:$0xff]  ;;  %1062 = vmatprep.subr.bf16.mxu1 %v1061_v60  ;;  %v204_v16 = vld [vmem:[#allocation9 + $0x3a0] sm:$0xff]  ;;  %v1069_v20 = vpack.c.bf16 %v167_v12, %v163_v11  ;;  %v162_v21 = vld [vmem:[#allocation9 + $0x250] sm:$0xff] }
  0x7b   :  { %1002 = vmatprep.subr.bf16.mxu0 %v1001_v6  ;;  %v1063_v6 = vpack.c.bf16 %v150_v62, %v146_v61  ;;  %v1025_v14 = vpack.c.bf16 %v205_v7, %v201_v5  ;;  %v166_v22 = vld [vmem:[#allocation9 + $0x270] sm:$0xff]  ;;  %v171_v23 = vld [vmem:[#allocation9 + $0x298] sm:$0xff]  ;;  %v1027_v25 = vpack.c.bf16 %v204_v16, %v200_v15  ;;  %v208_v27 = vld [vmem:[#allocation9 + $0x3c0] sm:$0xff] }
  0x7c   :  { %v175_v24 = vld [vmem:[#allocation9 + $0x2b8] sm:$0xff]  ;;  %v212_v28 = vld [vmem:[#allocation9 + $0x3e0] sm:$0xff]  ;;  %v174_v32 = vld [vmem:[#allocation9 + $0x2b0] sm:$0xff] }
  0x7d   :  { %1064 = vmatpush1.bf16.msra.mxu1 %v1063_v6  ;;  %v1073_v31 = vpack.c.bf16 %v175_v24, %v171_v23  ;;  %v391_v33 = vld [vmem:[#allocation11 + $0x8] sm:$0xff]  ;;  %v179_v35 = vld [vmem:[#allocation9 + $0x2d8] sm:$0xff]  ;;  %v1031_v37 = vpack.c.bf16 %v212_v28, %v208_v27  ;;  %v178_v39 = vld [vmem:[#allocation9 + $0x2d0] sm:$0xff] }
  0x7e   :  { %1004 = vmatpush1.bf16.msra.mxu0 %v1003_v17  ;;  %v209_v17 = vld [vmem:[#allocation9 + $0x3c8] sm:$0xff]  ;;  %1066 = vmatprep.subr.bf16.mxu1 %v1065_v8  ;;  %v183_v36 = vld [vmem:[#allocation9 + $0x2f8] sm:$0xff]  ;;  %v182_v44 = vld [vmem:[#allocation9 + $0x2f0] sm:$0xff] }
  0x7f   :  { %1006 = vmatprep.subr.bf16.mxu0 %v1005_v18  ;;  %v1067_v18 = vpack.c.bf16 %v158_v10, %v154_v9  ;;  %v1029_v26 = vpack.c.bf16 %v213_v19, %v209_v17  ;;  %v395_v34 = vld [vmem:[#allocation11 + $0x28] sm:$0xff]  ;;  %v1077_v43 = vpack.c.bf16 %v183_v36, %v179_v35  ;;  %v187_v47 = vld [vmem:[#allocation9 + $0x318] sm:$0xff]  ;;  %v1625_v49 = vld [vmem:[#allocation3] sm:$0xff]  ;;  %v1079_v51 = vpack.c.bf16 %v182_v44, %v178_v39 }
  0x80   :  { %v1097_v40 = vpack.c.bf16 %v395_v34, %v391_v33  ;;  %v399_v45 = vld [vmem:[#allocation11 + $0x48] sm:$0xff]  ;;  %v191_v48 = vld [vmem:[#allocation9 + $0x338] sm:$0xff]  ;;  %v186_v52 = vld [vmem:[#allocation9 + $0x310] sm:$0xff] }
  0x81   :  { %1068 = vmatpush1.bf16.msra.mxu1 %v1067_v18  ;;  %v403_v46 = vld [vmem:[#allocation11 + $0x68] sm:$0xff]  ;;  %v402_v55 = vld [vmem:[#allocation11 + $0x60] sm:$0xff]  ;;  %v1081_v56 = vpack.c.bf16 %v191_v48, %v187_v47  ;;  %v190_v57 = vld [vmem:[#allocation9 + $0x330] sm:$0xff] }
  0x82   :  { %1008 = vmatpush1.bf16.msra.mxu0 %v1007_v29  ;;  %v1071_v29 = vpack.c.bf16 %v166_v22, %v162_v21  ;;  %1070 = vmatprep.subr.bf16.mxu1 %v1069_v20  ;;  %v407_v58 = vld [vmem:[#allocation11 + $0x88] sm:$0xff]  ;;  %v195_v60 = vld [vmem:[#allocation9 + $0x358] sm:$0xff]  ;;  %v1083_v63 = vpack.c.bf16 %v190_v57, %v186_v52  ;;  %v194_v0 = vld [vmem:[#allocation9 + $0x350] sm:$0xff] }
  0x83   :  { %1010 = vmatprep.subr.bf16.mxu0 %v1009_v30  ;;  %v170_v30 = vld [vmem:[#allocation9 + $0x290] sm:$0xff]  ;;  %v411_v59 = vld [vmem:[#allocation11 + $0xa8] sm:$0xff]  ;;  %v199_v61 = vld [vmem:[#allocation9 + $0x378] sm:$0xff] }
  0x84   :  { %v1075_v38 = vpack.c.bf16 %v174_v32, %v170_v30  ;;  %v410_v3 = vld [vmem:[#allocation11 + $0xa0] sm:$0xff]  ;;  %v1085_v4 = vpack.c.bf16 %v199_v61, %v195_v60  ;;  %v198_v5 = vld [vmem:[#allocation9 + $0x370] sm:$0xff]  ;;  %v415_v6 = vld [vmem:[#allocation11 + $0xc8] sm:$0xff] }
  0x85   :  { %1072 = vmatpush1.bf16.msra.mxu1 %v1071_v29  ;;  %v419_v7 = vld [vmem:[#allocation11 + $0xe8] sm:$0xff]  ;;  %v203_v8 = vld [vmem:[#allocation9 + $0x398] sm:$0xff]  ;;  %v1087_v11 = vpack.c.bf16 %v198_v5, %v194_v0  ;;  %v202_v12 = vld [vmem:[#allocation9 + $0x390] sm:$0xff] }
  0x86   :  { %1012 = vmatpush1.bf16.msra.mxu0 %v1011_v41  ;;  %v390_v41 = vld [vmem:[#allocation11] sm:$0xff]  ;;  %1074 = vmatprep.subr.bf16.mxu1 %v1073_v31  ;;  %v207_v9 = vld [vmem:[#allocation9 + $0x3b8] sm:$0xff]  ;;  %v206_v17 = vld [vmem:[#allocation9 + $0x3b0] sm:$0xff] }
  0x87   :  { %1014 = vmatprep.subr.bf16.mxu0 %v1013_v42  ;;  %v394_v42 = vld [vmem:[#allocation11 + $0x20] sm:$0xff]  ;;  %v1089_v16 = vpack.c.bf16 %v207_v9, %v203_v8  ;;  %v423_v18 = vld [vmem:[#allocation11 + $0x108] sm:$0xff]  ;;  %v211_v20 = vld [vmem:[#allocation9 + $0x3d8] sm:$0xff]  ;;  %v1091_v23 = vpack.c.bf16 %v206_v17, %v202_v12 }
  0x88   :  { %v1099_v50 = vpack.c.bf16 %v394_v42, %v390_v41  ;;  %v418_v15 = vld [vmem:[#allocation11 + $0xe0] sm:$0xff]  ;;  %v427_v19 = vld [vmem:[#allocation11 + $0x128] sm:$0xff]  ;;  %v215_v21 = vld [vmem:[#allocation9 + $0x3f8] sm:$0xff] }
  0x89   :  { %1076 = vmatpush1.bf16.msra.mxu1 %v1075_v38  ;;  %v210_v24 = vld [vmem:[#allocation9 + $0x3d0] sm:$0xff]  ;;  %v426_v27 = vld [vmem:[#allocation11 + $0x120] sm:$0xff]  ;;  %v1093_v28 = vpack.c.bf16 %v215_v21, %v211_v20  ;;  %v431_v30 = vld [vmem:[#allocation11 + $0x148] sm:$0xff] }
  0x8a   :  { %1016 = vmatpush1.bf16.msra.mxu0 %v1015_v53  ;;  %v1101_v53 = vpack.c.bf16 %v403_v46, %v399_v45  ;;  %1078 = vmatprep.subr.bf16.mxu1 %v1077_v43  ;;  %v214_v29 = vld [vmem:[#allocation9 + $0x3f0] sm:$0xff]  ;;  %v435_v31 = vld [vmem:[#allocation11 + $0x168] sm:$0xff]  ;;  %v393_v32 = vld [vmem:[#allocation11 + $0x18] sm:$0xff] }
  0x8b   :  { %1018 = vmatprep.subr.bf16.mxu0 %v1017_v54  ;;  %v398_v54 = vld [vmem:[#allocation11 + $0x40] sm:$0xff]  ;;  %v397_v33 = vld [vmem:[#allocation11 + $0x38] sm:$0xff]  ;;  %v1095_v35 = vpack.c.bf16 %v214_v29, %v210_v24  ;;  %v392_v36 = vld [vmem:[#allocation11 + $0x10] sm:$0xff] }
  0x8c   :  { %v1103_v62 = vpack.c.bf16 %v402_v55, %v398_v54  ;;  %v430_v38 = vld [vmem:[#allocation11 + $0x140] sm:$0xff]  ;;  %v396_v41 = vld [vmem:[#allocation11 + $0x30] sm:$0xff]  ;;  %v439_v42 = vld [vmem:[#allocation11 + $0x188] sm:$0xff] }
  0x8d   :  { %1080 = vmatpush1.bf16.msra.mxu1 %v1079_v51  ;;  %v434_v39 = vld [vmem:[#allocation11 + $0x160] sm:$0xff]  ;;  %v443_v43 = vld [vmem:[#allocation11 + $0x1a8] sm:$0xff]  ;;  %v401_v44 = vld [vmem:[#allocation11 + $0x58] sm:$0xff]  ;;  %v1227_v47 = vpack.c.bf16 %v396_v41, %v392_v36 }
  0x8e   :  { %1020 = vmatpush1.bf16.msra.mxu0 %v1019_v1  ;;  %v1105_v1 = vpack.c.bf16 %v411_v59, %v407_v58  ;;  %1082 = vmatprep.subr.bf16.mxu1 %v1081_v56  ;;  %v405_v45 = vld [vmem:[#allocation11 + $0x78] sm:$0xff]  ;;  %v1119_v46 = vpack.c.bf16 %v434_v39, %v430_v38  ;;  %v400_v48 = vld [vmem:[#allocation11 + $0x50] sm:$0xff]  ;;  %v438_v51 = vld [vmem:[#allocation11 + $0x180] sm:$0xff] }
  0x8f   :  { %1022 = vmatprep.subr.bf16.mxu0 %v1021_v2  ;;  %v406_v2 = vld [vmem:[#allocation11 + $0x80] sm:$0xff]  ;;  %v404_v54 = vld [vmem:[#allocation11 + $0x70] sm:$0xff]  ;;  %v447_v55 = vld [vmem:[#allocation11 + $0x1c8] sm:$0xff] }
  0x90   :  { %v1107_v10 = vpack.c.bf16 %v410_v3, %v406_v2  ;;  %v442_v52 = vld [vmem:[#allocation11 + $0x1a0] sm:$0xff]  ;;  %v451_v56 = vld [vmem:[#allocation11 + $0x1e8] sm:$0xff]  ;;  %v409_v57 = vld [vmem:[#allocation11 + $0x98] sm:$0xff]  ;;  %v1231_v60 = vpack.c.bf16 %v404_v54, %v400_v48 }
  0x91   :  { %1084 = vmatpush1.bf16.msra.mxu1 %v1083_v63  ;;  %v413_v58 = vld [vmem:[#allocation11 + $0xb8] sm:$0xff]  ;;  %v1123_v59 = vpack.c.bf16 %v442_v52, %v438_v51  ;;  %v408_v61 = vld [vmem:[#allocation11 + $0x90] sm:$0xff]  ;;  %v446_v63 = vld [vmem:[#allocation11 + $0x1c0] sm:$0xff] }
  0x92   :  { %1024 = vmatpush1.bf16.msra.mxu0 %v1023_v13  ;;  %v1109_v13 = vpack.c.bf16 %v419_v7, %v415_v6  ;;  %1086 = vmatprep.subr.bf16.mxu1 %v1085_v4  ;;  %v450_v0 = vld [vmem:[#allocation11 + $0x1e0] sm:$0xff]  ;;  %v412_v2 = vld [vmem:[#allocation11 + $0xb0] sm:$0xff]  ;;  %v455_v3 = vld [vmem:[#allocation11 + $0x208] sm:$0xff] }
  0x93   :  { %1026 = vmatprep.subr.bf16.mxu0 %v1025_v14  ;;  %v414_v14 = vld [vmem:[#allocation11 + $0xc0] sm:$0xff]  ;;  %v459_v4 = vld [vmem:[#allocation11 + $0x228] sm:$0xff]  ;;  %v417_v5 = vld [vmem:[#allocation11 + $0xd8] sm:$0xff]  ;;  %v1127_v7 = vpack.c.bf16 %v450_v0, %v446_v63 }
  0x94   :  { %v1111_v22 = vpack.c.bf16 %v418_v15, %v414_v14  ;;  %v421_v6 = vld [vmem:[#allocation11 + $0xf8] sm:$0xff]  ;;  %v416_v8 = vld [vmem:[#allocation11 + $0xd0] sm:$0xff]  ;;  %v1129_v9 = vpack.c.bf16 %v459_v4, %v455_v3  ;;  %v463_v14 = vld [vmem:[#allocation11 + $0x248] sm:$0xff] }
  0x95   :  { %1088 = vmatpush1.bf16.msra.mxu1 %v1087_v11  ;;  %v458_v11 = vld [vmem:[#allocation11 + $0x220] sm:$0xff]  ;;  %v1237_v12 = vpack.c.bf16 %v421_v6, %v417_v5  ;;  %v467_v15 = vld [vmem:[#allocation11 + $0x268] sm:$0xff]  ;;  %v429_v17 = vld [vmem:[#allocation11 + $0x138] sm:$0xff] }
  0x96   :  { %1028 = vmatpush1.bf16.msra.mxu0 %v1027_v25  ;;  %v1113_v25 = vpack.c.bf16 %v427_v19, %v423_v18  ;;  %1090 = vmatprep.subr.bf16.mxu1 %v1089_v16  ;;  %v425_v16 = vld [vmem:[#allocation11 + $0x118] sm:$0xff]  ;;  %v424_v20 = vld [vmem:[#allocation11 + $0x110] sm:$0xff]  ;;  %v1133_v21 = vpack.c.bf16 %v467_v15, %v463_v14  ;;  %v479_v38 = vld [vmem:[#allocation11 + $0x2c8] sm:$0xff] }
  0x97   :  { %1030 = vmatprep.subr.bf16.mxu0 %v1029_v26  ;;  %v422_v26 = vld [vmem:[#allocation11 + $0x100] sm:$0xff]  ;;  %v1241_v24 = vpack.c.bf16 %v429_v17, %v425_v16  ;;  %v437_v29 = vld [vmem:[#allocation11 + $0x178] sm:$0xff]  ;;  %v483_v39 = vld [vmem:[#allocation11 + $0x2e8] sm:$0xff] }
  0x98   :  { %v1115_v34 = vpack.c.bf16 %v426_v27, %v422_v26  ;;  %v471_v26 = vld [vmem:[#allocation11 + $0x288] sm:$0xff]  ;;  %v445_v41 = vld [vmem:[#allocation11 + $0x1b8] sm:$0xff]  ;;  %v456_v5 = vld [vmem:[#allocation11 + $0x210] sm:$0xff] }
  0x99   :  { %1092 = vmatpush1.bf16.msra.mxu1 %v1091_v23  ;;  %v466_v23 = vld [vmem:[#allocation11 + $0x260] sm:$0xff]  ;;  %v475_v27 = vld [vmem:[#allocation11 + $0x2a8] sm:$0xff]  ;;  %v453_v54 = vld [vmem:[#allocation11 + $0x1f8] sm:$0xff] }
  0x9a   :  { %1032 = vmatpush1.bf16.msra.mxu0 %v1031_v37  ;;  %v1117_v37 = vpack.c.bf16 %v435_v31, %v431_v30  ;;  %1094 = vmatprep.subr.bf16.mxu1 %v1093_v28  ;;  %v433_v28 = vld [vmem:[#allocation11 + $0x158] sm:$0xff]  ;;  %v487_v51 = vld [vmem:[#allocation11 + $0x308] sm:$0xff]  ;;  %v502_v17 = vld [vmem:[#allocation11 + $0x380] sm:$0xff] }
  0x9b   :  { %1098 = vmatprep.subr.bf16.mxu0 %v1097_v40  ;;  %v1225_v40 = vpack.c.bf16 %v397_v33, %v393_v32  ;;  %v432_v32 = vld [vmem:[#allocation11 + $0x150] sm:$0xff]  ;;  %v1137_v33 = vpack.c.bf16 %v475_v27, %v471_v26  ;;  %v1245_v36 = vpack.c.bf16 %v437_v29, %v433_v28  ;;  %v491_v52 = vld [vmem:[#allocation11 + $0x328] sm:$0xff]  ;;  %v481_v29 = vld [vmem:[#allocation11 + $0x2d8] sm:$0xff] }
  0x9c   :  { %v495_v63 = vld [vmem:[#allocation11 + $0x348] sm:$0xff]  ;;  %v472_v27 = vld [vmem:[#allocation11 + $0x290] sm:$0xff] }
  0x9d   :  { %281 = vmatmul.mubr.f32.vlgmr.msra.gmra.mrb[0].mxu0 %v1625_v49  ;;  %1096 = vmatpush1.bf16.msra.mxu1 %v1095_v35  ;;  %v474_v35 = vld [vmem:[#allocation11 + $0x2a0] sm:$0xff]  ;;  %v499_v0 = vld [vmem:[#allocation11 + $0x368] sm:$0xff]  ;;  %v476_v28 = vld [vmem:[#allocation11 + $0x2b0] sm:$0xff] }
  0x9e   :  { %1100 = vmatpush1.bf16.msra.mxu0 %v1099_v50  ;;  %v1121_v50 = vpack.c.bf16 %v443_v43, %v439_v42  ;;  %1226 = vmatprep.subr.bf16.mxu1 %v1225_v40  ;;  %v441_v40 = vld [vmem:[#allocation11 + $0x198] sm:$0xff]  ;;  %v1149_v6 = vpack.c.bf16 %v499_v0, %v495_v63  ;;  %v512_v0 = vld [vmem:[#allocation11 + $0x3d0] sm:$0xff] }
  0x9f   :  { %1102 = vmatprep.subr.bf16.mxu0 %v1101_v53  ;;  %v1229_v53 = vpack.c.bf16 %v405_v45, %v401_v44  ;;  %v440_v44 = vld [vmem:[#allocation11 + $0x190] sm:$0xff]  ;;  %v1141_v45 = vpack.c.bf16 %v483_v39, %v479_v38  ;;  %v1249_v48 = vpack.c.bf16 %v445_v41, %v441_v40  ;;  %v497_v41 = vld [vmem:[#allocation11 + $0x358] sm:$0xff] }
  0xa0   :  { %352 = vmatmul.mubr.f32.vlgmr.msra.gmra.mrb[0].mxu1 %v1625_v49  ;;  %v1235_v49 = vpack.c.bf16 %v412_v2, %v408_v61  ;;  %v461_v2 = vld [vmem:[#allocation11 + $0x238] sm:$0xff]  ;;  %v488_v39 = vld [vmem:[#allocation11 + $0x310] sm:$0xff] }
  0xa1   :  { %1228 = vmatpush1.bf16.msra.mxu1 %v1227_v47  ;;  %v482_v47 = vld [vmem:[#allocation11 + $0x2e0] sm:$0xff]  ;;  %v492_v40 = vld [vmem:[#allocation11 + $0x330] sm:$0xff] }
  0xa2   :  { %1104 = vmatpush1.bf16.msra.mxu0 %v1103_v62  ;;  %v1125_v62 = vpack.c.bf16 %v451_v56, %v447_v55  ;;  %1230 = vmatprep.subr.bf16.mxu1 %v1229_v53  ;;  %v449_v53 = vld [vmem:[#allocation11 + $0x1d8] sm:$0xff] }
  0xa3   :  { %1106 = vmatprep.subr.bf16.mxu0 %v1105_v1  ;;  %v1233_v1 = vpack.c.bf16 %v413_v58, %v409_v57  ;;  %v448_v57 = vld [vmem:[#allocation11 + $0x1d0] sm:$0xff]  ;;  %v1145_v58 = vpack.c.bf16 %v491_v52, %v487_v51  ;;  %v1253_v61 = vpack.c.bf16 %v453_v54, %v449_v53 }
  0xa4   :  { %v504_v52 = vld [vmem:[#allocation11 + $0x390] sm:$0xff] }
  0xa5   :  { %1232 = vmatpush1.bf16.msra.mxu1 %v1231_v60  ;;  %v490_v60 = vld [vmem:[#allocation11 + $0x320] sm:$0xff]  ;;  %v508_v53 = vld [vmem:[#allocation11 + $0x3b0] sm:$0xff] }
  0xa6   :  { %1108 = vmatpush1.bf16.msra.mxu0 %v1107_v10  ;;  %v454_v10 = vld [vmem:[#allocation11 + $0x200] sm:$0xff]  ;;  %1234 = vmatprep.subr.bf16.mxu1 %v1233_v1  ;;  %v457_v1 = vld [vmem:[#allocation11 + $0x218] sm:$0xff]  ;;  %v1283_v54 = vpack.c.bf16 %v508_v53, %v504_v52  ;;  %v543_v52 = vld [vmem:[#allocation11 + $0x4c8] sm:$0xff] }
  0xa7   :  { %1110 = vmatprep.subr.bf16.mxu0 %v1109_v13  ;;  %v420_v13 = vld [vmem:[#allocation11 + $0xf0] sm:$0xff]  ;;  %v1131_v18 = vpack.c.bf16 %v458_v11, %v454_v10  ;;  %v503_v10 = vld [vmem:[#allocation11 + $0x388] sm:$0xff] }
  0xa8   :  { %v1239_v19 = vpack.c.bf16 %v420_v13, %v416_v8  ;;  %v1257_v8 = vpack.c.bf16 %v461_v2, %v457_v1  ;;  %v507_v11 = vld [vmem:[#allocation11 + $0x3a8] sm:$0xff]  ;;  %v469_v13 = vld [vmem:[#allocation11 + $0x278] sm:$0xff]  ;;  %v516_v1 = vld [vmem:[#allocation11 + $0x3f0] sm:$0xff] }
  0xa9   :  { %1236 = vmatpush1.bf16.msra.mxu1 %v1235_v49  ;;  %v498_v49 = vld [vmem:[#allocation11 + $0x360] sm:$0xff]  ;;  %v1153_v16 = vpack.c.bf16 %v507_v11, %v503_v10  ;;  %v1287_v2 = vpack.c.bf16 %v516_v1, %v512_v0  ;;  %v358_v11 = vld [vmem:[%s1658_s3] sm:$0x3]  ;;  %v547_v53 = vld [vmem:[#allocation11 + $0x4e8] sm:$0xff]  ;;  %s1516_s3 = smov [#allocation12]  }
  0xaa   :  { %1112 = vmatpush1.bf16.msra.mxu0 %v1111_v22  ;;  %v462_v22 = vld [vmem:[#allocation11 + $0x240] sm:$0xff]  ;;  %1238 = vmatprep.subr.bf16.mxu1 %v1237_v12  ;;  %v465_v12 = vld [vmem:[#allocation11 + $0x258] sm:$0xff]  ;;  %v551_v0 = vld [vmem:[#allocation11 + $0x508] sm:$0xff]  ;;  %s958_s19 = sshll.u32 %s1516_s3, 4  ;;  %s959_s19 = int_to_ptr.vmem [resolvable:$true] %s958_s19 }
  0xab   :  { %1114 = vmatprep.subr.bf16.mxu0 %v1113_v25  ;;  %v428_v25 = vld [vmem:[#allocation11 + $0x130] sm:$0xff]  ;;  %v1135_v30 = vpack.c.bf16 %v466_v23, %v462_v22  ;;  %v473_v22 = vld [vmem:[#allocation11 + $0x298] sm:$0xff]  ;;  %v555_v1 = vld [vmem:[#allocation11 + $0x528] sm:$0xff]  ;;  %s1479_s9 = scalar_lea.vmem %s959_s19, 256  ;;  %p1484_p13 = scmp.lt.s32.totalorder %s959_s19, %s959_s19 }
  0xac   :  { %v1243_v31 = vpack.c.bf16 %v428_v25, %v424_v20  ;;  %v464_v20 = vld [vmem:[#allocation11 + $0x250] sm:$0xff]  ;;  %v477_v23 = vld [vmem:[#allocation11 + $0x2b8] sm:$0xff]  ;;  %p1480_p12 = scmp.ne.s32.totalorder %s959_s19, %s1479_s9  ;;  %p1485_p0 = scmp.lt.s32.totalorder %s1479_s9, %s1479_s9 }
  0xad   :  { %1240 = vmatpush1.bf16.msra.mxu1 %v1239_v19  ;;  %v1261_v19 = vpack.c.bf16 %v469_v13, %v465_v12  ;;  %v1265_v26 = vpack.c.bf16 %v477_v23, %v473_v22  ;;  %v520_v22 = vld [vmem:[#allocation11 + $0x410] sm:$0xff] }
  0xae   :  { %1116 = vmatpush1.bf16.msra.mxu0 %v1115_v34  ;;  %v470_v34 = vld [vmem:[#allocation11 + $0x280] sm:$0xff]  ;;  %1242 = vmatprep.subr.bf16.mxu1 %v1241_v24  ;;  %v524_v23 = vld [vmem:[#allocation11 + $0x430] sm:$0xff]  ;;  %p1486_p1 = por %p1485_p0, %p1484_p13 }
  0xaf   :  { %1118 = vmatprep.subr.bf16.mxu0 %v1117_v37  ;;  %v436_v37 = vld [vmem:[#allocation11 + $0x170] sm:$0xff]  ;;  %v1139_v42 = vpack.c.bf16 %v474_v35, %v470_v34  ;;  %v489_v35 = vld [vmem:[#allocation11 + $0x318] sm:$0xff] }
  0xb0   :  { %v1247_v43 = vpack.c.bf16 %v436_v37, %v432_v32  ;;  %v484_v34 = vld [vmem:[#allocation11 + $0x2f0] sm:$0xff]  ;;  %p1487_p2 = pnand %p1486_p1, %p1480_p12 }
  0xb1   :  { %1244 = vmatpush1.bf16.msra.mxu1 %v1243_v31  ;;  %v1267_v31 = vpack.c.bf16 %v476_v28, %v472_v27  ;;  %v529_v27 = vld [vmem:[#allocation11 + $0x458] sm:$0xff] }
  0xb2   :  { %1120 = vmatpush1.bf16.msra.mxu0 %v1119_v46  ;;  %v478_v46 = vld [vmem:[#allocation11 + $0x2c0] sm:$0xff]  ;;  %1246 = vmatprep.subr.bf16.mxu1 %v1245_v36  ;;  %v493_v36 = vld [vmem:[#allocation11 + $0x338] sm:$0xff] }
  0xb3   :  { %1122 = vmatprep.subr.bf16.mxu0 %v1121_v50  ;;  %v444_v50 = vld [vmem:[#allocation11 + $0x1b0] sm:$0xff]  ;;  %v1143_v55 = vpack.c.bf16 %v482_v47, %v478_v46  ;;  %v1273_v38 = vpack.c.bf16 %v493_v36, %v489_v35  ;;  %v505_v47 = vld [vmem:[#allocation11 + $0x398] sm:$0xff] }
  0xb4   :  { %v1251_v56 = vpack.c.bf16 %v444_v50, %v440_v44  ;;  %v500_v46 = vld [vmem:[#allocation11 + $0x370] sm:$0xff]  ;;  %v533_v28 = vld [vmem:[#allocation11 + $0x478] sm:$0xff] }
  0xb5   :  { %1248 = vmatpush1.bf16.msra.mxu1 %v1247_v43  ;;  %v1275_v43 = vpack.c.bf16 %v492_v40, %v488_v39  ;;  %v1293_v36 = vpack.c.bf16 %v533_v28, %v529_v27  ;;  %v535_v39 = vld [vmem:[#allocation11 + $0x488] sm:$0xff]  ;;  %v569_v28 = vld [vmem:[#allocation11 + $0x598] sm:$0xff] }
  0xb6   :  { %1124 = vmatpush1.bf16.msra.mxu0 %v1123_v59  ;;  %v486_v59 = vld [vmem:[#allocation11 + $0x300] sm:$0xff]  ;;  %1250 = vmatprep.subr.bf16.mxu1 %v1249_v48  ;;  %v509_v48 = vld [vmem:[#allocation11 + $0x3b8] sm:$0xff]  ;;  %v539_v40 = vld [vmem:[#allocation11 + $0x4a8] sm:$0xff] }
  0xb7   :  { %1126 = vmatprep.subr.bf16.mxu0 %v1125_v62  ;;  %v452_v62 = vld [vmem:[#allocation11 + $0x1f0] sm:$0xff]  ;;  %v1147_v3 = vpack.c.bf16 %v490_v60, %v486_v59  ;;  %v1281_v51 = vpack.c.bf16 %v509_v48, %v505_v47  ;;  %v517_v59 = vld [vmem:[#allocation11 + $0x3f8] sm:$0xff]  ;;  %v510_v60 = vld [vmem:[#allocation11 + $0x3c0] sm:$0xff]  ;;  %v1169_v47 = vpack.c.bf16 %v539_v40, %v535_v39 }
  0xb8   :  { %v1255_v4 = vpack.c.bf16 %v452_v62, %v448_v57  ;;  %v513_v57 = vld [vmem:[#allocation11 + $0x3d8] sm:$0xff]  ;;  %v568_v40 = vld [vmem:[#allocation11 + $0x590] sm:$0xff] }
  0xb9   :  { %1252 = vmatpush1.bf16.msra.mxu1 %v1251_v56  ;;  %v515_v56 = vld [vmem:[#allocation11 + $0x3e8] sm:$0xff]  ;;  %v1285_v62 = vpack.c.bf16 %v517_v59, %v513_v57  ;;  %v546_v59 = vld [vmem:[#allocation11 + $0x4e0] sm:$0xff] }
  0xba   :  { %1128 = vmatpush1.bf16.msra.mxu0 %v1127_v7  ;;  %v494_v7 = vld [vmem:[#allocation11 + $0x340] sm:$0xff]  ;;  %1254 = vmatprep.subr.bf16.mxu1 %v1253_v61 }
  0xbb   :  { %1130 = vmatprep.subr.bf16.mxu0 %v1129_v9  ;;  %v460_v9 = vld [vmem:[#allocation11 + $0x230] sm:$0xff]  ;;  %v1151_v14 = vpack.c.bf16 %v498_v49, %v494_v7  ;;  %v514_v61 = vld [vmem:[#allocation11 + $0x3e0] sm:$0xff]  ;;  %v525_v7 = vld [vmem:[#allocation11 + $0x438] sm:$0xff] }
  0xbc   :  { %v1259_v15 = vpack.c.bf16 %v460_v9, %v456_v5  ;;  %v1159_v63 = vpack.c.bf16 %v514_v61, %v510_v60  ;;  %v1173_v60 = vpack.c.bf16 %v547_v53, %v543_v52  ;;  %v576_v52 = vld [vmem:[#allocation11 + $0x5d0] sm:$0xff] }
  0xbd   :  { %1256 = vmatpush1.bf16.msra.mxu1 %v1255_v4  ;;  %v523_v4 = vld [vmem:[#allocation11 + $0x428] sm:$0xff]  ;;  %v580_v53 = vld [vmem:[#allocation11 + $0x5f0] sm:$0xff] }
  0xbe   :  { %1132 = vmatpush1.bf16.msra.mxu0 %v1131_v18  ;;  %v506_v18 = vld [vmem:[#allocation11 + $0x3a0] sm:$0xff]  ;;  %1258 = vmatprep.subr.bf16.mxu1 %v1257_v8  ;;  %v360_v8 = vlaneseq }
  0xbf   :  { %1134 = vmatprep.subr.bf16.mxu0 %v1133_v21  ;;  %v468_v21 = vld [vmem:[#allocation11 + $0x270] sm:$0xff]  ;;  %v1155_v24 = vpack.c.bf16 %v506_v18, %v502_v17  ;;  %v373_v17 = vld [vmem:[#allocation6 + $0x8] sm:$0xff]  ;;  %v518_v18 = vld [vmem:[#allocation11 + $0x400] sm:$0xff] }
  0xc0   :  { %v1263_v25 = vpack.c.bf16 %v468_v21, %v464_v20  ;;  %v361_v9 = vshrl.u32 %v360_v8, 7 }
  0xc1   :  { %1260 = vmatpush1.bf16.msra.mxu1 %v1259_v15 }
  0xc2   :  { %1136 = vmatpush1.bf16.msra.mxu0 %v1135_v30  ;;  %1262 = vmatprep.subr.bf16.mxu1 %v1261_v19  ;;  %v485_v30 = vld [vmem:[#allocation11 + $0x2f8] sm:$0xff]  ;;  %v362_v10 = vsub.s32 0, %v361_v9  ;;  %v366_v12 = vsub.s32 1, %v361_v9  ;;  %v522_v19 = vld [vmem:[#allocation11 + $0x420] sm:$0xff]  ;;  %v552_v9 = vld [vmem:[#allocation11 + $0x510] sm:$0xff] }
  0xc3   :  { %1138 = vmatprep.subr.bf16.mxu0 %v1137_v33  ;;  %v1269_v32 = vpack.c.bf16 %v485_v30, %v481_v29  ;;  %v480_v33 = vld [vmem:[#allocation11 + $0x2d0] sm:$0xff]  ;;  %v1163_v30 = vpack.c.bf16 %v522_v19, %v518_v18  ;;  %v558_v19 = vld [vmem:[#allocation11 + $0x540] sm:$0xff] }
  0xc4   :  { %v1271_v37 = vpack.c.bf16 %v484_v34, %v480_v33  ;;  %v1632_v13 = vrot.slane %v358_v11, %v362_v10  ;;  %v530_v33 = vld [vmem:[#allocation11 + $0x460] sm:$0xff]  ;;  %v556_v10 = vld [vmem:[#allocation11 + $0x530] sm:$0xff] }
  0xc5   :  { %1264 = vmatpush1.bf16.msra.mxu1 %v1263_v25  ;;  %v1307_v18 = vpack.c.bf16 %v556_v10, %v552_v9 }
  0xc6   :  { %1140 = vmatpush1.bf16.msra.mxu0 %v1139_v42  ;;  %1266 = vmatprep.subr.bf16.mxu1 %v1265_v26  ;;  %v501_v42 = vld [vmem:[#allocation11 + $0x378] sm:$0xff]  ;;  %v531_v26 = vld [vmem:[#allocation11 + $0x468] sm:$0xff] }
  0xc7   :  { %1142 = vmatprep.subr.bf16.mxu0 %v1141_v45  ;;  %v1277_v44 = vpack.c.bf16 %v501_v42, %v497_v41  ;;  %v496_v45 = vld [vmem:[#allocation11 + $0x350] sm:$0xff]  ;;  %v537_v41 = vld [vmem:[#allocation11 + $0x498] sm:$0xff] }
  0xc8   :  { %v1279_v50 = vpack.c.bf16 %v500_v46, %v496_v45  ;;  %v541_v42 = vld [vmem:[#allocation11 + $0x4b8] sm:$0xff]  ;;  %v534_v45 = vld [vmem:[#allocation11 + $0x480] sm:$0xff] }
  0xc9   :  { %1268 = vmatpush1.bf16.msra.mxu1 %v1267_v31  ;;  %v1291_v31 = vpack.c.bf16 %v524_v23, %v520_v22  ;;  %v538_v46 = vld [vmem:[#allocation11 + $0x4a0] sm:$0xff]  ;;  %v1297_v48 = vpack.c.bf16 %v541_v42, %v537_v41  ;;  %v572_v41 = vld [vmem:[#allocation11 + $0x5b0] sm:$0xff]  ;;  %v575_v42 = vld [vmem:[#allocation11 + $0x5c8] sm:$0xff] }
  0xca   :  { %1144 = vmatpush1.bf16.msra.mxu0 %v1143_v55  ;;  %1270 = vmatprep.subr.bf16.mxu1 %v1269_v32  ;;  %v511_v55 = vld [vmem:[#allocation11 + $0x3c8] sm:$0xff]  ;;  %v526_v32 = vld [vmem:[#allocation11 + $0x440] sm:$0xff] }
  0xcb   :  { %1146 = vmatprep.subr.bf16.mxu0 %v1145_v58  ;;  %v1157_v58 = vpack.c.bf16 %v515_v56, %v511_v55  ;;  %v549_v55 = vld [vmem:[#allocation11 + $0x4f8] sm:$0xff]  ;;  %v1171_v56 = vpack.c.bf16 %v538_v46, %v534_v45  ;;  %v1315_v46 = vpack.c.bf16 %v572_v41, %v568_v40  ;;  %v615_v40 = vld [vmem:[#allocation11 + $0x708] sm:$0xff] }
  0xcc   :  { %v581_v45 = vld [vmem:[#allocation11 + $0x5f8] sm:$0xff]  ;;  %v619_v41 = vld [vmem:[#allocation11 + $0x728] sm:$0xff] }
  0xcd   :  { %1272 = vmatpush1.bf16.msra.mxu1 %v1271_v37  ;;  %v528_v37 = vld [vmem:[#allocation11 + $0x450] sm:$0xff] }
  0xce   :  { %1148 = vmatpush1.bf16.msra.mxu0 %v1147_v3  ;;  %1274 = vmatprep.subr.bf16.mxu1 %v1273_v38  ;;  %v519_v3 = vld [vmem:[#allocation11 + $0x408] sm:$0xff]  ;;  %v532_v38 = vld [vmem:[#allocation11 + $0x470] sm:$0xff] }
  0xcf   :  { %1150 = vmatprep.subr.bf16.mxu0 %v1149_v6  ;;  %v1161_v5 = vpack.c.bf16 %v523_v4, %v519_v3  ;;  %v521_v6 = vld [vmem:[#allocation11 + $0x418] sm:$0xff] }
  0xd0   :  { %v1289_v49 = vpack.c.bf16 %v525_v7, %v521_v6  ;;  %v557_v3 = vld [vmem:[#allocation11 + $0x538] sm:$0xff]  ;;  %v550_v6 = vld [vmem:[#allocation11 + $0x500] sm:$0xff] }
  0xd1   :  { %1276 = vmatpush1.bf16.msra.mxu1 %v1275_v43  ;;  %v1167_v43 = vpack.c.bf16 %v530_v33, %v526_v32  ;;  %v554_v7 = vld [vmem:[#allocation11 + $0x520] sm:$0xff]  ;;  %v381_v32 = vld [vmem:[#allocation8 + $0x8] sm:$0xff] }
  0xd2   :  { %1152 = vmatpush1.bf16.msra.mxu0 %v1151_v14  ;;  %1278 = vmatprep.subr.bf16.mxu1 %v1277_v44  ;;  %v1634_v14 = vrot.slane %v358_v11, %v366_v12  ;;  %v1295_v44 = vpack.c.bf16 %v532_v38, %v528_v37  ;;  %v559_v11 = vld [vmem:[#allocation11 + $0x548] sm:$0xff]  ;;  %v570_v37 = vld [vmem:[#allocation11 + $0x5a0] sm:$0xff] }
  0xd3   :  { %1154 = vmatprep.subr.bf16.mxu0 %v1153_v16  ;;  %v372_v16 = vld [vmem:[#allocation6] sm:$0xff]  ;;  %v563_v12 = vld [vmem:[#allocation11 + $0x568] sm:$0xff] }
  0xd4   :  { %v1181_v22 = vpack.c.bf16 %v563_v12, %v559_v11  ;;  %v592_v11 = vld [vmem:[#allocation11 + $0x650] sm:$0xff] }
  0xd5   :  { %1280 = vmatpush1.bf16.msra.mxu1 %v1279_v50  ;;  %v536_v50 = vld [vmem:[#allocation11 + $0x490] sm:$0xff] }
  0xd6   :  { %1156 = vmatpush1.bf16.msra.mxu0 %v1155_v24  ;;  %1282 = vmatprep.subr.bf16.mxu1 %v1281_v51  ;;  %v527_v24 = vld [vmem:[#allocation11 + $0x448] sm:$0xff]  ;;  %v540_v51 = vld [vmem:[#allocation11 + $0x4b0] sm:$0xff] }
  0xd7   :  { %1158 = vmatprep.subr.bf16.mxu0 %v1157_v58  ;;  %v1165_v35 = vpack.c.bf16 %v531_v26, %v527_v24  ;;  %v1299_v57 = vpack.c.bf16 %v540_v51, %v536_v50  ;;  %v542_v58 = vld [vmem:[#allocation11 + $0x4c0] sm:$0xff]  ;;  %v564_v24 = vld [vmem:[#allocation11 + $0x570] sm:$0xff]  ;;  %v571_v26 = vld [vmem:[#allocation11 + $0x5a8] sm:$0xff] }
  0xd8   :  { %v1175_v4 = vpack.c.bf16 %v546_v59, %v542_v58  ;;  %v1319_v59 = vpack.c.bf16 %v580_v53, %v576_v52  ;;  %v596_v12 = vld [vmem:[#allocation11 + $0x670] sm:$0xff]  ;;  %v627_v52 = vld [vmem:[#allocation11 + $0x768] sm:$0xff]  ;;  %v625_v53 = vld [vmem:[#allocation11 + $0x758] sm:$0xff] }
  0xd9   :  { %1284 = vmatpush1.bf16.msra.mxu1 %v1283_v54  ;;  %v545_v54 = vld [vmem:[#allocation11 + $0x4d8] sm:$0xff] }
  0xda   :  { %1286 = vmatprep.subr.bf16.mxu1 %v1285_v62  ;;  %1160 = vmatpush1.bf16.msra.mxu0 %v1159_v63  ;;  %v1301_v61 = vpack.c.bf16 %v549_v55, %v545_v54  ;;  %v544_v62 = vld [vmem:[#allocation11 + $0x4d0] sm:$0xff]  ;;  %v583_v54 = vld [vmem:[#allocation11 + $0x608] sm:$0xff] }
  0xdb   :  { %1162 = vmatprep.subr.bf16.mxu0 %v1161_v5  ;;  %v548_v63 = vld [vmem:[#allocation11 + $0x4f0] sm:$0xff]  ;;  %v587_v55 = vld [vmem:[#allocation11 + $0x628] sm:$0xff] }
  0xdc   :  { %v1303_v5 = vpack.c.bf16 %v548_v63, %v544_v62  ;;  %v1193_v62 = vpack.c.bf16 %v587_v55, %v583_v54  ;;  %v629_v54 = vld [vmem:[#allocation11 + $0x778] sm:$0xff] }
  0xdd   :  { %1288 = vmatpush1.bf16.msra.mxu1 %v1287_v2  ;;  %v553_v2 = vld [vmem:[#allocation11 + $0x518] sm:$0xff] }
  0xde   :  { %1290 = vmatprep.subr.bf16.mxu1 %v1289_v49  ;;  %v1177_v49 = vpack.c.bf16 %v555_v1, %v551_v0  ;;  %v1305_v8 = vpack.c.bf16 %v557_v3, %v553_v2  ;;  %v584_v0 = vld [vmem:[#allocation11 + $0x610] sm:$0xff]  ;;  %v591_v2 = vld [vmem:[#allocation11 + $0x648] sm:$0xff] }
  0xdf   :  { %v588_v1 = vld [vmem:[#allocation11 + $0x630] sm:$0xff]  ;;  %v595_v3 = vld [vmem:[#allocation11 + $0x668] sm:$0xff] }
  0xe0   :  { %v1197_v9 = vpack.c.bf16 %v595_v3, %v591_v2  ;;  %v637_v2 = vld [vmem:[#allocation11 + $0x7b8] sm:$0xff] }
 0x170   :  { %v282_v15 = vpop.f32.mrb[0].mxu0 }
 0x171   :  { %v370_v20 = vmul.f32 %v1632_v13, %v282_v15  ;;  %v284_v21 = vpop.f32.mrb[1].mxu0  ;;  %v561_v15 = vld [vmem:[#allocation11 + $0x558] sm:$0xff] }
 0x172   :  { %v371_v25 = vmul.f32 %v1634_v14, %v284_v21  ;;  %v560_v21 = vld [vmem:[#allocation11 + $0x550] sm:$0xff] }
 0x173   :  { %v374_v34 = vadd.f32 %v372_v16, %v370_v20  ;;  %v565_v16 = vld [vmem:[#allocation11 + $0x578] sm:$0xff]  ;;  %v562_v20 = vld [vmem:[#allocation11 + $0x560] sm:$0xff]  ;;  %v353_v27 = vpop.f32.mrb[0].mxu1 }
 0x174   :  { %v375_v29 = vadd.f32 %v373_v17, %v371_v25  ;;  %v1179_v17 = vpack.c.bf16 %v554_v7, %v550_v6  ;;  %v1309_v23 = vpack.c.bf16 %v565_v16, %v561_v15  ;;  %v567_v25 = vld [vmem:[#allocation11 + $0x588] sm:$0xff]  ;;  %v1323_v7 = vpack.c.bf16 %v588_v1, %v584_v0  ;;  %v633_v1 = vld [vmem:[#allocation11 + $0x798] sm:$0xff] }
 0x175   :  { %v1185_v38 = vpack.c.bf16 %v571_v26, %v567_v25  ;;  %v599_v15 = vld [vmem:[#allocation11 + $0x688] sm:$0xff]  ;;  %v600_v25 = vld [vmem:[#allocation11 + $0x690] sm:$0xff] }
 0x176   :  { %710 = vmatprep.mubr.f32.mxu0 %v375_v29  ;;  %852 = vmatprep.mubr.f32.mxu1 %v375_v29  ;;  %v573_v29 = vld [vmem:[#allocation11 + $0x5b8] sm:$0xff]  ;;  %v603_v16 = vld [vmem:[#allocation11 + $0x6a8] sm:$0xff]  ;;  %v604_v26 = vld [vmem:[#allocation11 + $0x6b0] sm:$0xff] }
 0x177   :  { %711 = vmatmul.mubr.f32.vlgmr.msra.gmra.mrb[2].mxu0 %v374_v34  ;;  %853 = vmatmul.mubr.f32.vlgmr.msra.gmra.mrb[2].mxu1 %v374_v34  ;;  %v1183_v34 = vpack.c.bf16 %v562_v20, %v558_v19  ;;  %v1313_v39 = vpack.c.bf16 %v573_v29, %v569_v28  ;;  %v1327_v20 = vpack.c.bf16 %v596_v12, %v592_v11  ;;  %v611_v28 = vld [vmem:[#allocation11 + $0x6e8] sm:$0xff]  ;;  %v609_v29 = vld [vmem:[#allocation11 + $0x6d8] sm:$0xff] }
 0x178   :  { %1164 = vmatpush1.bf16.msra.mxu0 %v1163_v30  ;;  %1292 = vmatpush1.bf16.msra.mxu1 %v1291_v31  ;;  %v1639_v30 = vmul.f32 %v1632_v13, %v353_v27  ;;  %v355_v31 = vpop.f32.mrb[1].mxu1  ;;  %v579_v13 = vld [vmem:[#allocation11 + $0x5e8] sm:$0xff]  ;;  %v641_v12 = vld [vmem:[#allocation11 + $0x7d8] sm:$0xff] }
 0x179   :  { %1166 = vmatprep.subr.bf16.mxu0 %v1165_v35  ;;  %1294 = vmatprep.subr.bf16.mxu1 %v1293_v36  ;;  %v379_v33 = vmul.f32 %v1634_v14, %v355_v31  ;;  %v1311_v35 = vpack.c.bf16 %v564_v24, %v560_v21  ;;  %v566_v36 = vld [vmem:[#allocation11 + $0x580] sm:$0xff]  ;;  %v1189_v50 = vpack.c.bf16 %v579_v13, %v575_v42  ;;  %v607_v27 = vld [vmem:[#allocation11 + $0x6c8] sm:$0xff]  ;;  %v613_v31 = vld [vmem:[#allocation11 + $0x6f8] sm:$0xff] }
 0x17a   :  { %v1187_v14 = vpack.c.bf16 %v570_v37, %v566_v36  ;;  %v598_v21 = vld [vmem:[#allocation11 + $0x680] sm:$0xff]  ;;  %v1205_v36 = vpack.c.bf16 %v611_v28, %v607_v27  ;;  %v1333_v37 = vpack.c.bf16 %v613_v31, %v609_v29  ;;  %v617_v42 = vld [vmem:[#allocation11 + $0x718] sm:$0xff]  ;;  %v635_v0 = vld [vmem:[#allocation11 + $0x7a8] sm:$0xff] }
 0x17b   :  { %v643_v11 = vld [vmem:[#allocation11 + $0x7e8] sm:$0xff] }
 0x17c   :  { %1168 = vmatpush1.bf16.msra.mxu0 %v1167_v43  ;;  %1296 = vmatpush1.bf16.msra.mxu1 %v1295_v44  ;;  %v383_v43 = vadd.f32 %v381_v32, %v379_v33  ;;  %v577_v44 = vld [vmem:[#allocation11 + $0x5d8] sm:$0xff]  ;;  %v1331_v33 = vpack.c.bf16 %v604_v26, %v600_v25  ;;  %v380_v26 = vld [vmem:[#allocation8] sm:$0xff] }
 0x17d   :  { %1170 = vmatprep.subr.bf16.mxu0 %v1169_v47  ;;  %1298 = vmatprep.subr.bf16.mxu1 %v1297_v48  ;;  %v574_v47 = vld [vmem:[#allocation11 + $0x5c0] sm:$0xff]  ;;  %v1317_v51 = vpack.c.bf16 %v581_v45, %v577_v44  ;;  %v382_v27 = vadd.f32 %v380_v26, %v1639_v30 }
 0x17e   :  { %781 = vmatprep.mubr.f32.mxu0 %v383_v43  ;;  %923 = vmatprep.mubr.f32.mxu1 %v383_v43  ;;  %v578_v48 = vld [vmem:[#allocation11 + $0x5e0] sm:$0xff]  ;;  %v621_v43 = vld [vmem:[#allocation11 + $0x738] sm:$0xff] }
 0x17f   :  { %v1191_v58 = vpack.c.bf16 %v578_v48, %v574_v47  ;;  %v614_v45 = vld [vmem:[#allocation11 + $0x700] sm:$0xff]  ;;  %v1337_v47 = vpack.c.bf16 %v621_v43, %v617_v42  ;;  %v616_v48 = vld [vmem:[#allocation11 + $0x710] sm:$0xff] }
 0x180   :  { %1172 = vmatpush1.bf16.msra.mxu0 %v1171_v56  ;;  %1300 = vmatpush1.bf16.msra.mxu1 %v1299_v57  ;;  %v585_v56 = vld [vmem:[#allocation11 + $0x618] sm:$0xff] }
 0x181   :  { %1174 = vmatprep.subr.bf16.mxu0 %v1173_v60  ;;  %1302 = vmatprep.subr.bf16.mxu1 %v1301_v61  ;;  %v589_v57 = vld [vmem:[#allocation11 + $0x638] sm:$0xff]  ;;  %v582_v60 = vld [vmem:[#allocation11 + $0x600] sm:$0xff] }
 0x182   :  { %v586_v61 = vld [vmem:[#allocation11 + $0x620] sm:$0xff]  ;;  %v1321_v63 = vpack.c.bf16 %v589_v57, %v585_v56 }
 0x183   :  { %v1195_v6 = vpack.c.bf16 %v586_v61, %v582_v60  ;;  %v622_v57 = vld [vmem:[#allocation11 + $0x740] sm:$0xff]  ;;  %v1341_v60 = vpack.c.bf16 %v629_v54, %v625_v53  ;;  %v624_v61 = vld [vmem:[#allocation11 + $0x750] sm:$0xff] }
 0x184   :  { %1176 = vmatpush1.bf16.msra.mxu0 %v1175_v4  ;;  %1304 = vmatpush1.bf16.msra.mxu1 %v1303_v5  ;;  %v593_v4 = vld [vmem:[#allocation11 + $0x658] sm:$0xff] }
 0x185   :  { %1178 = vmatprep.subr.bf16.mxu0 %v1177_v49  ;;  %1306 = vmatprep.subr.bf16.mxu1 %v1305_v8  ;;  %v597_v5 = vld [vmem:[#allocation11 + $0x678] sm:$0xff]  ;;  %v590_v49 = vld [vmem:[#allocation11 + $0x640] sm:$0xff] }
 0x186   :  { %v594_v8 = vld [vmem:[#allocation11 + $0x660] sm:$0xff]  ;;  %v1325_v10 = vpack.c.bf16 %v597_v5, %v593_v4 }
 0x187   :  { %v1199_v19 = vpack.c.bf16 %v594_v8, %v590_v49  ;;  %v630_v5 = vld [vmem:[#allocation11 + $0x780] sm:$0xff]  ;;  %v1345_v49 = vpack.c.bf16 %v637_v2, %v633_v1  ;;  %v632_v8 = vld [vmem:[#allocation11 + $0x790] sm:$0xff] }
 0x188   :  { %1180 = vmatpush1.bf16.msra.mxu0 %v1179_v17  ;;  %1308 = vmatpush1.bf16.msra.mxu1 %v1307_v18  ;;  %v601_v17 = vld [vmem:[#allocation11 + $0x698] sm:$0xff] }
 0x189   :  { %1182 = vmatprep.subr.bf16.mxu0 %v1181_v22  ;;  %1310 = vmatprep.subr.bf16.mxu1 %v1309_v23  ;;  %v605_v18 = vld [vmem:[#allocation11 + $0x6b8] sm:$0xff]  ;;  %v602_v22 = vld [vmem:[#allocation11 + $0x6a0] sm:$0xff]  ;;  %v1201_v23 = vpack.c.bf16 %v603_v16, %v599_v15 }
 0x18a   :  { %v1329_v24 = vpack.c.bf16 %v605_v18, %v601_v17  ;;  %v1203_v32 = vpack.c.bf16 %v602_v22, %v598_v21  ;;  %v645_v15 = vld [vmem:[#allocation11 + $0x7f8] sm:$0xff]  ;;  %v638_v18 = vld [vmem:[#allocation11 + $0x7c0] sm:$0xff]  ;;  %v640_v22 = vld [vmem:[#allocation11 + $0x7d0] sm:$0xff] }
 0x18b   :  { %v642_v21 = vld [vmem:[#allocation11 + $0x7e0] sm:$0xff] }
 0x18c   :  { %1184 = vmatpush1.bf16.msra.mxu0 %v1183_v34  ;;  %1312 = vmatpush1.bf16.msra.mxu1 %v1311_v35  ;;  %v606_v34 = vld [vmem:[#allocation11 + $0x6c0] sm:$0xff] }
 0x18d   :  { %1186 = vmatprep.subr.bf16.mxu0 %v1185_v38  ;;  %1314 = vmatprep.subr.bf16.mxu1 %v1313_v39  ;;  %v610_v35 = vld [vmem:[#allocation11 + $0x6e0] sm:$0xff]  ;;  %v608_v38 = vld [vmem:[#allocation11 + $0x6d0] sm:$0xff] }
 0x18e   :  { %v612_v39 = vld [vmem:[#allocation11 + $0x6f0] sm:$0xff]  ;;  %v1207_v13 = vpack.c.bf16 %v610_v35, %v606_v34 }
 0x18f   :  { %v1335_v44 = vpack.c.bf16 %v612_v39, %v608_v38 }
 0x190   :  { %1188 = vmatpush1.bf16.msra.mxu0 %v1187_v14  ;;  %1316 = vmatpush1.bf16.msra.mxu1 %v1315_v46  ;;  %v618_v14 = vld [vmem:[#allocation11 + $0x720] sm:$0xff]  ;;  %v1209_v46 = vpack.c.bf16 %v619_v41, %v615_v40 }
 0x191   :  { %1190 = vmatprep.subr.bf16.mxu0 %v1189_v50  ;;  %1318 = vmatprep.subr.bf16.mxu1 %v1317_v51  ;;  %v620_v50 = vld [vmem:[#allocation11 + $0x730] sm:$0xff]  ;;  %v623_v51 = vld [vmem:[#allocation11 + $0x748] sm:$0xff]  ;;  %v1211_v55 = vpack.c.bf16 %v618_v14, %v614_v45 }
 0x192   :  { %v1339_v56 = vpack.c.bf16 %v620_v50, %v616_v48 }
 0x194   :  { %1192 = vmatpush1.bf16.msra.mxu0 %v1191_v58  ;;  %1320 = vmatpush1.bf16.msra.mxu1 %v1319_v59  ;;  %v626_v58 = vld [vmem:[#allocation11 + $0x760] sm:$0xff]  ;;  %v1213_v59 = vpack.c.bf16 %v627_v52, %v623_v51 }
 0x195   :  { %1194 = vmatprep.subr.bf16.mxu0 %v1193_v62  ;;  %1322 = vmatprep.subr.bf16.mxu1 %v1321_v63  ;;  %v628_v62 = vld [vmem:[#allocation11 + $0x770] sm:$0xff]  ;;  %v631_v63 = vld [vmem:[#allocation11 + $0x788] sm:$0xff]  ;;  %v1215_v3 = vpack.c.bf16 %v626_v58, %v622_v57 }
 0x196   :  { %v1343_v4 = vpack.c.bf16 %v628_v62, %v624_v61 }
 0x198   :  { %1196 = vmatpush1.bf16.msra.mxu0 %v1195_v6  ;;  %1324 = vmatpush1.bf16.msra.mxu1 %v1323_v7  ;;  %v634_v6 = vld [vmem:[#allocation11 + $0x7a0] sm:$0xff]  ;;  %v1217_v7 = vpack.c.bf16 %v635_v0, %v631_v63 }
 0x199   :  { %1198 = vmatprep.subr.bf16.mxu0 %v1197_v9  ;;  %1326 = vmatprep.subr.bf16.mxu1 %v1325_v10  ;;  %v636_v9 = vld [vmem:[#allocation11 + $0x7b0] sm:$0xff]  ;;  %v639_v10 = vld [vmem:[#allocation11 + $0x7c8] sm:$0xff]  ;;  %v1219_v16 = vpack.c.bf16 %v634_v6, %v630_v5 }
 0x19a   :  { %v1347_v17 = vpack.c.bf16 %v636_v9, %v632_v8 }
 0x19c   :  { %1200 = vmatpush1.bf16.msra.mxu0 %v1199_v19  ;;  %1328 = vmatpush1.bf16.msra.mxu1 %v1327_v20  ;;  %v1221_v19 = vpack.c.bf16 %v643_v11, %v639_v10  ;;  %v1349_v20 = vpack.c.bf16 %v645_v15, %v641_v12 }
 0x19d   :  { %1202 = vmatprep.subr.bf16.mxu0 %v1201_v23  ;;  %1330 = vmatprep.subr.bf16.mxu1 %v1329_v24  ;;  %v644_v23 = vld [vmem:[#allocation11 + $0x7f0] sm:$0xff]  ;;  %v1223_v24 = vpack.c.bf16 %v642_v21, %v638_v18 }
 0x19e   :  { %v1351_v25 = vpack.c.bf16 %v644_v23, %v640_v22 }
 0x1a0   :  { %1204 = vmatpush1.bf16.msra.mxu0 %v1203_v32  ;;  %1332 = vmatpush1.bf16.msra.mxu1 %v1331_v33 }
 0x1a1   :  { %1206 = vmatprep.subr.bf16.mxu0 %v1205_v36  ;;  %1334 = vmatprep.subr.bf16.mxu1 %v1333_v37 }
 0x1a4   :  { %1208 = vmatpush1.bf16.msra.mxu0 %v1207_v13  ;;  %1336 = vmatpush1.bf16.msra.mxu1 %v1335_v44 }
 0x1a5   :  { %1210 = vmatprep.subr.bf16.mxu0 %v1209_v46  ;;  %1338 = vmatprep.subr.bf16.mxu1 %v1337_v47 }
 0x1a8   :  { %1212 = vmatpush1.bf16.msra.mxu0 %v1211_v55  ;;  %1340 = vmatpush1.bf16.msra.mxu1 %v1339_v56 }
 0x1a9   :  { %1214 = vmatprep.subr.bf16.mxu0 %v1213_v59  ;;  %1342 = vmatprep.subr.bf16.mxu1 %v1341_v60 }
 0x1ac   :  { %1216 = vmatpush1.bf16.msra.mxu0 %v1215_v3  ;;  %1344 = vmatpush1.bf16.msra.mxu1 %v1343_v4 }
 0x1ad   :  { %1218 = vmatprep.subr.bf16.mxu0 %v1217_v7  ;;  %1346 = vmatprep.subr.bf16.mxu1 %v1345_v49 }
 0x1b0   :  { %1220 = vmatpush1.bf16.msra.mxu0 %v1219_v16  ;;  %1348 = vmatpush1.bf16.msra.mxu1 %v1347_v17 }
 0x1b1   :  { %1222 = vmatprep.subr.bf16.mxu0 %v1221_v19  ;;  %1350 = vmatprep.subr.bf16.mxu1 %v1349_v20 }
 0x1b4   :  { %1224 = vmatpush1.bf16.msra.mxu0 %v1223_v24  ;;  %1352 = vmatpush1.bf16.msra.mxu1 %v1351_v25 }
 0x1b7   :  { %782 = vmatmul.mubr.f32.vlgmr.msra.gmra.mrb[2].mxu0 %v382_v27  ;;  %924 = vmatmul.mubr.f32.vlgmr.msra.gmra.mrb[2].mxu1 %v382_v27 }
 0x28a   :  { %v783_v28 = vpop.f32.mrb[2].mxu0  ;;  %v925_v29 = vpop.f32.mrb[2].mxu1 }
 0x28b   :  { %v930_v31 = vmul.f32 %v783_v28, %v783_v28  ;;  %v932_v32 = vmul.f32 %v925_v29, %v925_v29  ;;  %v785_v33 = vpop.f32.mrb[3].mxu0  ;;  %v927_v34 = vpop.f32.mrb[3].mxu1 }
 0x28c   :  { %v931_v35 = vmul.f32 %v785_v33, %v785_v33  ;;  %v933_v36 = vmul.f32 %v927_v34, %v927_v34 }
 0x28d   :  { %v934_v37 = vadd.f32 %v932_v32, %v930_v31 }
 0x28e   :  { %v935_v38 = vadd.f32 %v933_v36, %v931_v35 }
 0x28f   :  { %1365 = vrsqrt.f32 %v934_v37  ;;  %vm938_vm0 = vcmp.eq.f32.partialorder %v934_v37, inf  ;;  %v941_v30 = vand.u32 2147483648, %v934_v37  ;;  %vm940_vm1 = vcmp.eq.f32.partialorder %v934_v37, 0.0 }
 0x290   :  { %1367 = vrsqrt.f32 %v935_v38  ;;  %vm945_vm2 = vcmp.eq.f32.partialorder %v935_v38, inf  ;;  %v948_v13 = vand.u32 2147483648, %v935_v38  ;;  %vm947_vm3 = vcmp.eq.f32.partialorder %v935_v38, 0.0 }
 0x299   :  { %v1366_v39 = vpop.eup %1365 }
 0x29a   :  { %v1368_v40 = vpop.eup %1367  ;;  %v937_v41 = vmul.f32 %v1366_v39, %v934_v37 }
 0x29b   :  { %v944_v42 = vmul.f32 %v1368_v40, %v935_v38 }
 0x29c   :  { %v939_v43 = vsel %vm938_vm0, %v934_v37, %v937_v41 }
 0x29d   :  { %v942_v44 = vsel %vm940_vm1, %v941_v30, %v939_v43  ;;  %v946_v45 = vsel %vm945_vm2, %v935_v38, %v944_v42 }
 0x29e   :  { %v949_v14 = vsel %vm947_vm3, %v948_v13, %v946_v45  ;;  %950 = vst [vmem:[#allocation12] sm:$0xff] %v942_v44 }
 0x29f   :  { %951 = vst [vmem:[#allocation12 + $0x8] sm:$0xff] %v949_v14 }
 0x2a0   :  { %1490 = shalt.err (!%p1487_p2)
}
 0x2a1   :  { %s1491_s10 = scalar_lea.hbm %s1661_s6, 256 }
 0x2a2   :  { %p1492_p3 = scmp.ne.s32.totalorder %s1661_s6, %s1491_s10  ;;  %p1495_p4 = scmp.lt.u32.totalorder %s1491_s10, %s1661_s6 }
 0x2a4   :  { %p1497_p5 = pnand %p1495_p4, %p1492_p3 }
 0x2a6   :  { %1500 = shalt.err (!%p1497_p5)
}
 0x2a7   :  { %961 = dma.vmem_to_hbm [thread:$0]  %s959_s19, 256, %s1661_s6, [#allocation5]  }
 0x2a8   :  { %1507 = dma.done.wait [#allocation5], 256  }
 0x2a9   :  { %1508 = vsyncadd [#allocation5], 4294967040 }
 0x2aa   :  { %965 = vsyncpa [#allocation4], 1 }
 0x2ab   :  { %966 = vsyncpa [#allocation7], 1 }
 0x2ac   :  { %967 = vsyncpa [#allocation10], 1 }
 0x2ad   :  { %968 = vsyncpa [#allocation5], 1 }

</bundles_post_ra>
